<compile_context>
chip_gen: v7x
topology: tpu7x:2x2x1
jax: 0.10.0
libtpu: 0.0.40
codegen_flags: <defaults>
</compile_context>

<pallas_src>
import functools

import jax
import jax.numpy as jnp
import numpy as np
from jax.experimental import pallas as pl
from jax.experimental.pallas import tpu as pltpu


# ------------------------------ Slab layouts -------------------------------------- #

def _round_up(n, m):
    return ((n + m - 1) // m) * m


def _lstm_layout(input_dim, hidden, num_layers):
    """Row offsets of (wih_t, whh_t, bias) per layer inside the packed LSTM slab."""
    layout = []
    row = 0
    for l in range(num_layers):
        in_dim = input_dim if l == 0 else hidden
        wih_off = row
        row += _round_up(in_dim, 8)
        whh_off = row
        row += _round_up(hidden, 8)
        b_off = row
        row += 8
        layout.append({"in_dim": in_dim, "wih": wih_off, "whh": whh_off, "b": b_off})
    return layout, row


def _fc_layout(hidden):
    """Row offsets of (fw1, fb1, fw2, fb2) inside the packed fc slab (width = hidden//2)."""
    h2 = hidden // 2
    fw1_off = 0
    fb1_off = _round_up(hidden, 8)
    fw2_off = fb1_off + 8
    fb2_off = fw2_off + _round_up(h2, 8)
    total = fb2_off + 8
    return fw1_off, fb1_off, fw2_off, fb2_off, total


# ----------------------------- Fused Pallas kernel ------------------------------ #

def _make_fused_kernel(seq, batch, num_layers, hidden, input_dim, out_dim):
    """Fused (LSTM stack wavefront + fc head) kernel for static shapes.

    Refs:
      x_ref    : (seq*batch, input_dim)  time-major flattened input
      lstm_ref : (rows, 4H) packed [wih_t | whh_t | bias] per layer (8-row aligned sections)
      fc_ref   : (rows, H//2) packed [fw1 | fb1 | fw2(pad) | fb2(pad)]
      o_ref    : (batch, out_dim)
    Gate column order in the LSTM slab is (i, f, o, g).
    """
    H = hidden
    H2 = H // 2
    layout, _ = _lstm_layout(input_dim, hidden, num_layers)
    fw1_off, fb1_off, fw2_off, fb2_off, _ = _fc_layout(hidden)

    def kernel(x_ref, lstm_ref, fc_ref, o_ref):
        # Per-layer weight views (static, 8-row-aligned ref slices; off the serial path).
        wih, whh, bias = [], [], []
        for l in range(num_layers):
            L = layout[l]
            wih.append(lstm_ref[L["wih"]:L["wih"] + L["in_dim"], :])      # (in, 4H)
            whh.append(lstm_ref[L["whh"]:L["whh"] + H, :])                # (H, 4H)
            bias.append(lstm_ref[L["b"]:L["b"] + 1, :])                   # (1, 4H)

        # Layer-0 input projection hoisted: one batched matmul over all timesteps.
        xp0 = jnp.dot(x_ref[...], wih[0],
                      preferred_element_type=jnp.float32) + bias[0]       # (seq*B, 4H)

        def cell(gates, c_prev):
            sig = jax.nn.sigmoid(gates[:, :3 * H])        # (i | f | o) in one EUP push
            g = jnp.tanh(gates[:, 3 * H:])
            c_new = sig[:, H:2 * H] * c_prev + sig[:, :H] * g
            h_new = sig[:, 2 * H:] * jnp.tanh(c_new)
            return h_new, c_new

        h = [jnp.zeros((batch, H), jnp.float32) for _ in range(num_layers)]
        c = [jnp.zeros((batch, H), jnp.float32) for _ in range(num_layers)]

        # Layer/time wavefront: t outer, layer inner.  Layer l at time t depends only on
        # h[l-1](t) and h[l](t-1), so the serial chain is seq + num_layers - 1 cells.
        for t in range(seq):
            for l in range(num_layers):
                if l == 0:
                    g_in = xp0[t * batch:(t + 1) * batch, :]
                else:
                    g_in = jnp.dot(h[l - 1], wih[l],
                                   preferred_element_type=jnp.float32) + bias[l]
                if t == 0:
                    gates = g_in                                # h[l] == 0 at t == 0
                else:
                    gates = g_in + jnp.dot(h[l], whh[l],
                                           preferred_element_type=jnp.float32)
                h[l], c[l] = cell(gates, c[l])

        # fc head: Linear(H, H//2) -> ReLU -> [Dropout = identity, eval] -> Linear(H//2, 2)
        # Loaded only AFTER the unrolled recurrence to keep vreg pressure low there.
        # TODO(synk): training-mode dropout (RNG mask via pltpu.prng_*) not implemented.
        fw1 = fc_ref[fw1_off:fw1_off + H, :]                    # (H, H2)
        fb1 = fc_ref[fb1_off:fb1_off + 1, :]                    # (1, H2)
        fw2 = fc_ref[fw2_off:fw2_off + H2, :]                   # (H2, H2), zero-padded cols
        fb2 = fc_ref[fb2_off:fb2_off + 1, :]                    # (1, H2), zero-padded cols
        hid = jnp.maximum(
            jnp.dot(h[-1], fw1, preferred_element_type=jnp.float32) + fb1, 0.0)
        out = jnp.dot(hid, fw2, preferred_element_type=jnp.float32) + fb2   # (B, H2)
        o_ref[...] = out[:, :out_dim]

    return kernel


# ------------------------------ Forward wrapper ---------------------------------- #

def simple_model_forward(prepared, x, *, seq_len, hidden_dim, num_layers, out_dim):
    """x: (B, seq, input_dim), batch_first (PyTorch convention). Returns (B, out_dim)."""
    B, T, D = x.shape
    assert T == seq_len
    x_flat = jnp.transpose(x.astype(jnp.float32), (1, 0, 2)).reshape(seq_len * B, D)

    kernel = _make_fused_kernel(seq_len, B, num_layers, hidden_dim, D, out_dim)
    return pl.pallas_call(
        kernel,
        out_shape=jax.ShapeDtypeStruct((B, out_dim), jnp.float32),
        in_specs=[pl.BlockSpec(memory_space=pltpu.MemorySpace.VMEM)] * 3,
        out_specs=pl.BlockSpec(memory_space=pltpu.MemorySpace.VMEM),
        # Whole model is ~70 KiB resident; no grid needed.  TODO(synk): add a batch-parallel
        # grid with dimension_semantics=("parallel",) only if B grows to O(100s) of rows.
    )(x_flat, prepared["lstm_slab"], prepared["fc_slab"])


# --------------------------- Parameter init / prep -------------------------------- #

def init_params(key, input_dim, hidden_dim, num_layers):
    """PyTorch-layout parameters (gate order i, f, g, o; weights (4H, in) / (4H, H))."""
    k = 1.0 / np.sqrt(hidden_dim)
    params = {"lstm": []}
    for layer in range(num_layers):
        in_dim = input_dim if layer == 0 else hidden_dim
        key, k1, k2, k3, k4 = jax.random.split(key, 5)
        params["lstm"].append({
            "w_ih": jax.random.uniform(k1, (4 * hidden_dim, in_dim), jnp.float32, -k, k),
            "w_hh": jax.random.uniform(k2, (4 * hidden_dim, hidden_dim), jnp.float32, -k, k),
            "b_ih": jax.random.uniform(k3, (4 * hidden_dim,), jnp.float32, -k, k),
            "b_hh": jax.random.uniform(k4, (4 * hidden_dim,), jnp.float32, -k, k),
        })
    key, k1, k2, k3, k4 = jax.random.split(key, 5)
    half = hidden_dim // 2
    params["w1"] = jax.random.uniform(k1, (half, hidden_dim), jnp.float32, -k, k)
    params["b1"] = jax.random.uniform(k2, (half,), jnp.float32, -k, k)
    params["w2"] = jax.random.uniform(k3, (2, half), jnp.float32, -k, k)
    params["b2"] = jax.random.uniform(k4, (2,), jnp.float32, -k, k)
    return params


def _reorder_gates(w, H):
    """Permute PyTorch gate order (i, f, g, o) -> kernel order (i, f, o, g) on axis 0."""
    w = np.asarray(w, np.float32)
    return np.concatenate([w[:H], w[H:2 * H], w[3 * H:], w[2 * H:3 * H]], axis=0)


def prepare_params(params, input_dim, hidden_dim, num_layers):
    """One-time conversion: reorder gates, transpose, combine biases, pack into 2 slabs."""
    H = hidden_dim
    H2 = H // 2
    layout, lstm_rows = _lstm_layout(input_dim, H, num_layers)
    lstm_slab = np.zeros((lstm_rows, 4 * H), np.float32)
    for l, layer in enumerate(params["lstm"]):
        w_ih = _reorder_gates(layer["w_ih"], H)                 # (4H, in)
        w_hh = _reorder_gates(layer["w_hh"], H)                 # (4H, H)
        b = _reorder_gates(layer["b_ih"], H) + _reorder_gates(layer["b_hh"], H)
        L = layout[l]
        lstm_slab[L["wih"]:L["wih"] + L["in_dim"], :] = w_ih.T
        lstm_slab[L["whh"]:L["whh"] + H, :] = w_hh.T
        lstm_slab[L["b"], :] = b

    fw1_off, fb1_off, fw2_off, fb2_off, fc_rows = _fc_layout(H)
    out_dim = int(np.asarray(params["w2"]).shape[0])
    fc_slab = np.zeros((fc_rows, H2), np.float32)
    fc_slab[fw1_off:fw1_off + H, :] = np.asarray(params["w1"], np.float32).T
    fc_slab[fb1_off, :] = np.asarray(params["b1"], np.float32)
    fc_slab[fw2_off:fw2_off + H2, :out_dim] = np.asarray(params["w2"], np.float32).T
    fc_slab[fb2_off, :out_dim] = np.asarray(params["b2"], np.float32)

    return {"lstm_slab": jnp.asarray(lstm_slab), "fc_slab": jnp.asarray(fc_slab)}


# ------------------------ Pure-JAX reference check ------------------------- #

def reference_forward(params, x):
    """Reference on the ORIGINAL PyTorch-layout params (gate order i, f, g, o)."""
    h_seq = jnp.transpose(x, (1, 0, 2)).astype(jnp.float32)      # (T, B, in)
    for layer in params["lstm"]:
        w_ih, w_hh = layer["w_ih"], layer["w_hh"]
        b = layer["b_ih"] + layer["b_hh"]
        H = w_hh.shape[1]
        B = h_seq.shape[1]
        h = jnp.zeros((B, H), jnp.float32)
        c = jnp.zeros((B, H), jnp.float32)
        outs = []
        for t in range(h_seq.shape[0]):
            gates = h_seq[t] @ w_ih.T + h @ w_hh.T + b
            i = jax.nn.sigmoid(gates[:, 0 * H:1 * H])
            f = jax.nn.sigmoid(gates[:, 1 * H:2 * H])
            g = jnp.tanh(gates[:, 2 * H:3 * H])
            o = jax.nn.sigmoid(gates[:, 3 * H:4 * H])
            c = f * c + i * g
            h = o * jnp.tanh(c)
            outs.append(h)
        h_seq = jnp.stack(outs, axis=0)
    last = h_seq[-1]
    hid = jnp.maximum(last @ params["w1"].T + params["b1"], 0.0)
    return hid @ params["w2"].T + params["b2"]


# --------------------------------- Main ------------------------------------ #

if __name__ == "__main__":
    # config: history_length (seq) = 8, hidden_dim = 32, num_layers = 2, dropout = 0.1 (eval)
    INPUT_DIM = 5
    SEQ_LEN = 8
    HIDDEN = 32
    NUM_LAYERS = 2
    BATCH = 2
    OUT_DIM = 2

    key = jax.random.PRNGKey(0)
    key, pkey, xkey = jax.random.split(key, 3)
    params = init_params(pkey, INPUT_DIM, HIDDEN, NUM_LAYERS)
    prepared = prepare_params(params, INPUT_DIM, HIDDEN, NUM_LAYERS)
    x = jax.random.normal(xkey, (BATCH, SEQ_LEN, INPUT_DIM), jnp.float32)

    fwd = jax.jit(functools.partial(simple_model_forward,
                                    seq_len=SEQ_LEN, hidden_dim=HIDDEN,
                                    num_layers=NUM_LAYERS, out_dim=OUT_DIM))
    logits = fwd(prepared, x)
    jax.block_until_ready(logits)

    ref = reference_forward(params, x)
    np.testing.assert_allclose(np.asarray(logits), np.asarray(ref),
                               rtol=1e-4, atol=1e-5)
    assert logits.shape == (BATCH, OUT_DIM)

    print("KERNEL_OK")
</pallas_src>

<mosaic_0001>
module attributes {stable_mosaic.version = 11 : i64} {
  func.func @kernel(%arg0: memref<16x5xf32, #tpu.memory_space<vmem>>, %arg1: memref<120x128xf32, #tpu.memory_space<vmem>>, %arg2: memref<64x16xf32, #tpu.memory_space<vmem>>, %arg3: memref<2x2xf32, #tpu.memory_space<vmem>>) attributes {dimension_semantics = [], scalar_prefetch = 0 : i64, scratch_operands = 0 : i64, tpu.core_type = #tpu.core_type<tc>} {
    %c0 = arith.constant 0 : index
    %c0_0 = arith.constant 0 : index
    %0 = vector.load %arg1[%c0, %c0_0] : memref<120x128xf32, #tpu.memory_space<vmem>>, vector<5x128xf32>
    %c8 = arith.constant 8 : index
    %c0_1 = arith.constant 0 : index
    %1 = vector.load %arg1[%c8, %c0_1] : memref<120x128xf32, #tpu.memory_space<vmem>>, vector<32x128xf32>
    %c40 = arith.constant 40 : index
    %c0_2 = arith.constant 0 : index
    %2 = vector.load %arg1[%c40, %c0_2] : memref<120x128xf32, #tpu.memory_space<vmem>>, vector<1x128xf32>
    %c48 = arith.constant 48 : index
    %c0_3 = arith.constant 0 : index
    %3 = vector.load %arg1[%c48, %c0_3] : memref<120x128xf32, #tpu.memory_space<vmem>>, vector<32x128xf32>
    %c80 = arith.constant 80 : index
    %c0_4 = arith.constant 0 : index
    %4 = vector.load %arg1[%c80, %c0_4] : memref<120x128xf32, #tpu.memory_space<vmem>>, vector<32x128xf32>
    %c112 = arith.constant 112 : index
    %c0_5 = arith.constant 0 : index
    %5 = vector.load %arg1[%c112, %c0_5] : memref<120x128xf32, #tpu.memory_space<vmem>>, vector<1x128xf32>
    %c0_6 = arith.constant 0 : index
    %c0_7 = arith.constant 0 : index
    %6 = vector.load %arg0[%c0_6, %c0_7] : memref<16x5xf32, #tpu.memory_space<vmem>>, vector<16x5xf32>
    %cst = arith.constant dense<0.000000e+00> : vector<16x128xf32>
    %7 = tpu.matmul %6, %0, %cst {dimension_numbers = #tpu.dot_dimension_numbers<[1], [0], [0], [1], [0, 0, 1, 1], [], []>} : vector<16x5xf32>, vector<5x128xf32>, vector<16x128xf32> -> vector<16x128xf32>
    %8 = vector.broadcast %2 : vector<1x128xf32> to vector<16x128xf32>
    %9 = arith.addf %7, %8 : vector<16x128xf32>
    %cst_8 = arith.constant 0.000000e+00 : f32
    %10 = vector.broadcast %cst_8 : f32 to vector<2x32xf32>
    %cst_9 = arith.constant 0.000000e+00 : f32
    %11 = vector.broadcast %cst_9 : f32 to vector<2x32xf32>
    %12 = vector.extract_strided_slice %9 {offsets = [0, 0], sizes = [2, 128], strides = [1, 1]} : vector<16x128xf32> to vector<2x128xf32>
    %13 = vector.extract_strided_slice %12 {offsets = [0, 0], sizes = [2, 96], strides = [1, 1]} : vector<2x128xf32> to vector<2x96xf32>
    %14 = arith.negf %13 : vector<2x96xf32>
    %15 = math.exp %14 : vector<2x96xf32>
    %cst_10 = arith.constant 1.000000e+00 : f32
    %16 = vector.broadcast %cst_10 : f32 to vector<2x96xf32>
    %17 = arith.addf %16, %15 : vector<2x96xf32>
    %18 = arith.divf %16, %17 : vector<2x96xf32>
    %19 = vector.extract_strided_slice %12 {offsets = [0, 96], sizes = [2, 32], strides = [1, 1]} : vector<2x128xf32> to vector<2x32xf32>
    %20 = math.tanh %19 : vector<2x32xf32>
    %21 = vector.extract_strided_slice %18 {offsets = [0, 32], sizes = [2, 32], strides = [1, 1]} : vector<2x96xf32> to vector<2x32xf32>
    %22 = arith.mulf %21, %10 : vector<2x32xf32>
    %23 = vector.extract_strided_slice %18 {offsets = [0, 0], sizes = [2, 32], strides = [1, 1]} : vector<2x96xf32> to vector<2x32xf32>
    %24 = arith.mulf %23, %20 : vector<2x32xf32>
    %25 = arith.addf %22, %24 : vector<2x32xf32>
    %26 = vector.extract_strided_slice %18 {offsets = [0, 64], sizes = [2, 32], strides = [1, 1]} : vector<2x96xf32> to vector<2x32xf32>
    %27 = math.tanh %25 : vector<2x32xf32>
    %28 = arith.mulf %26, %27 : vector<2x32xf32>
    %cst_11 = arith.constant dense<0.000000e+00> : vector<2x128xf32>
    %29 = tpu.matmul %28, %3, %cst_11 {dimension_numbers = #tpu.dot_dimension_numbers<[1], [0], [0], [1], [0, 0, 1, 1], [], []>} : vector<2x32xf32>, vector<32x128xf32>, vector<2x128xf32> -> vector<2x128xf32>
    %30 = vector.broadcast %5 : vector<1x128xf32> to vector<2x128xf32>
    %31 = arith.addf %29, %30 : vector<2x128xf32>
    %32 = vector.extract_strided_slice %31 {offsets = [0, 0], sizes = [2, 96], strides = [1, 1]} : vector<2x128xf32> to vector<2x96xf32>
    %33 = arith.negf %32 : vector<2x96xf32>
    %34 = math.exp %33 : vector<2x96xf32>
    %cst_12 = arith.constant 1.000000e+00 : f32
    %35 = vector.broadcast %cst_12 : f32 to vector<2x96xf32>
    %36 = arith.addf %35, %34 : vector<2x96xf32>
    %37 = arith.divf %35, %36 : vector<2x96xf32>
    %38 = vector.extract_strided_slice %31 {offsets = [0, 96], sizes = [2, 32], strides = [1, 1]} : vector<2x128xf32> to vector<2x32xf32>
    %39 = math.tanh %38 : vector<2x32xf32>
    %40 = vector.extract_strided_slice %37 {offsets = [0, 32], sizes = [2, 32], strides = [1, 1]} : vector<2x96xf32> to vector<2x32xf32>
    %41 = arith.mulf %40, %11 : vector<2x32xf32>
    %42 = vector.extract_strided_slice %37 {offsets = [0, 0], sizes = [2, 32], strides = [1, 1]} : vector<2x96xf32> to vector<2x32xf32>
    %43 = arith.mulf %42, %39 : vector<2x32xf32>
    %44 = arith.addf %41, %43 : vector<2x32xf32>
    %45 = vector.extract_strided_slice %37 {offsets = [0, 64], sizes = [2, 32], strides = [1, 1]} : vector<2x96xf32> to vector<2x32xf32>
    %46 = math.tanh %44 : vector<2x32xf32>
    %47 = arith.mulf %45, %46 : vector<2x32xf32>
    %48 = vector.extract_strided_slice %9 {offsets = [2, 0], sizes = [2, 128], strides = [1, 1]} : vector<16x128xf32> to vector<2x128xf32>
    %cst_13 = arith.constant dense<0.000000e+00> : vector<2x128xf32>
    %49 = tpu.matmul %28, %1, %cst_13 {dimension_numbers = #tpu.dot_dimension_numbers<[1], [0], [0], [1], [0, 0, 1, 1], [], []>} : vector<2x32xf32>, vector<32x128xf32>, vector<2x128xf32> -> vector<2x128xf32>
    %50 = arith.addf %48, %49 : vector<2x128xf32>
    %51 = vector.extract_strided_slice %50 {offsets = [0, 0], sizes = [2, 96], strides = [1, 1]} : vector<2x128xf32> to vector<2x96xf32>
    %52 = arith.negf %51 : vector<2x96xf32>
    %53 = math.exp %52 : vector<2x96xf32>
    %cst_14 = arith.constant 1.000000e+00 : f32
    %54 = vector.broadcast %cst_14 : f32 to vector<2x96xf32>
    %55 = arith.addf %54, %53 : vector<2x96xf32>
    %56 = arith.divf %54, %55 : vector<2x96xf32>
    %57 = vector.extract_strided_slice %50 {offsets = [0, 96], sizes = [2, 32], strides = [1, 1]} : vector<2x128xf32> to vector<2x32xf32>
    %58 = math.tanh %57 : vector<2x32xf32>
    %59 = vector.extract_strided_slice %56 {offsets = [0, 32], sizes = [2, 32], strides = [1, 1]} : vector<2x96xf32> to vector<2x32xf32>
    %60 = arith.mulf %59, %25 : vector<2x32xf32>
    %61 = vector.extract_strided_slice %56 {offsets = [0, 0], sizes = [2, 32], strides = [1, 1]} : vector<2x96xf32> to vector<2x32xf32>
    %62 = arith.mulf %61, %58 : vector<2x32xf32>
    %63 = arith.addf %60, %62 : vector<2x32xf32>
    %64 = vector.extract_strided_slice %56 {offsets = [0, 64], sizes = [2, 32], strides = [1, 1]} : vector<2x96xf32> to vector<2x32xf32>
    %65 = math.tanh %63 : vector<2x32xf32>
    %66 = arith.mulf %64, %65 : vector<2x32xf32>
    %cst_15 = arith.constant dense<0.000000e+00> : vector<2x128xf32>
    %67 = tpu.matmul %66, %3, %cst_15 {dimension_numbers = #tpu.dot_dimension_numbers<[1], [0], [0], [1], [0, 0, 1, 1], [], []>} : vector<2x32xf32>, vector<32x128xf32>, vector<2x128xf32> -> vector<2x128xf32>
    %68 = vector.broadcast %5 : vector<1x128xf32> to vector<2x128xf32>
    %69 = arith.addf %67, %68 : vector<2x128xf32>
    %cst_16 = arith.constant dense<0.000000e+00> : vector<2x128xf32>
    %70 = tpu.matmul %47, %4, %cst_16 {dimension_numbers = #tpu.dot_dimension_numbers<[1], [0], [0], [1], [0, 0, 1, 1], [], []>} : vector<2x32xf32>, vector<32x128xf32>, vector<2x128xf32> -> vector<2x128xf32>
    %71 = arith.addf %69, %70 : vector<2x128xf32>
    %72 = vector.extract_strided_slice %71 {offsets = [0, 0], sizes = [2, 96], strides = [1, 1]} : vector<2x128xf32> to vector<2x96xf32>
    %73 = arith.negf %72 : vector<2x96xf32>
    %74 = math.exp %73 : vector<2x96xf32>
    %cst_17 = arith.constant 1.000000e+00 : f32
    %75 = vector.broadcast %cst_17 : f32 to vector<2x96xf32>
    %76 = arith.addf %75, %74 : vector<2x96xf32>
    %77 = arith.divf %75, %76 : vector<2x96xf32>
    %78 = vector.extract_strided_slice %71 {offsets = [0, 96], sizes = [2, 32], strides = [1, 1]} : vector<2x128xf32> to vector<2x32xf32>
    %79 = math.tanh %78 : vector<2x32xf32>
    %80 = vector.extract_strided_slice %77 {offsets = [0, 32], sizes = [2, 32], strides = [1, 1]} : vector<2x96xf32> to vector<2x32xf32>
    %81 = arith.mulf %80, %44 : vector<2x32xf32>
    %82 = vector.extract_strided_slice %77 {offsets = [0, 0], sizes = [2, 32], strides = [1, 1]} : vector<2x96xf32> to vector<2x32xf32>
    %83 = arith.mulf %82, %79 : vector<2x32xf32>
    %84 = arith.addf %81, %83 : vector<2x32xf32>
    %85 = vector.extract_strided_slice %77 {offsets = [0, 64], sizes = [2, 32], strides = [1, 1]} : vector<2x96xf32> to vector<2x32xf32>
    %86 = math.tanh %84 : vector<2x32xf32>
    %87 = arith.mulf %85, %86 : vector<2x32xf32>
    %88 = vector.extract_strided_slice %9 {offsets = [4, 0], sizes = [2, 128], strides = [1, 1]} : vector<16x128xf32> to vector<2x128xf32>
    %cst_18 = arith.constant dense<0.000000e+00> : vector<2x128xf32>
    %89 = tpu.matmul %66, %1, %cst_18 {dimension_numbers = #tpu.dot_dimension_numbers<[1], [0], [0], [1], [0, 0, 1, 1], [], []>} : vector<2x32xf32>, vector<32x128xf32>, vector<2x128xf32> -> vector<2x128xf32>
    %90 = arith.addf %88, %89 : vector<2x128xf32>
    %91 = vector.extract_strided_slice %90 {offsets = [0, 0], sizes = [2, 96], strides = [1, 1]} : vector<2x128xf32> to vector<2x96xf32>
    %92 = arith.negf %91 : vector<2x96xf32>
    %93 = math.exp %92 : vector<2x96xf32>
    %cst_19 = arith.constant 1.000000e+00 : f32
    %94 = vector.broadcast %cst_19 : f32 to vector<2x96xf32>
    %95 = arith.addf %94, %93 : vector<2x96xf32>
    %96 = arith.divf %94, %95 : vector<2x96xf32>
    %97 = vector.extract_strided_slice %90 {offsets = [0, 96], sizes = [2, 32], strides = [1, 1]} : vector<2x128xf32> to vector<2x32xf32>
    %98 = math.tanh %97 : vector<2x32xf32>
    %99 = vector.extract_strided_slice %96 {offsets = [0, 32], sizes = [2, 32], strides = [1, 1]} : vector<2x96xf32> to vector<2x32xf32>
    %100 = arith.mulf %99, %63 : vector<2x32xf32>
    %101 = vector.extract_strided_slice %96 {offsets = [0, 0], sizes = [2, 32], strides = [1, 1]} : vector<2x96xf32> to vector<2x32xf32>
    %102 = arith.mulf %101, %98 : vector<2x32xf32>
    %103 = arith.addf %100, %102 : vector<2x32xf32>
    %104 = vector.extract_strided_slice %96 {offsets = [0, 64], sizes = [2, 32], strides = [1, 1]} : vector<2x96xf32> to vector<2x32xf32>
    %105 = math.tanh %103 : vector<2x32xf32>
    %106 = arith.mulf %104, %105 : vector<2x32xf32>
    %cst_20 = arith.constant dense<0.000000e+00> : vector<2x128xf32>
    %107 = tpu.matmul %106, %3, %cst_20 {dimension_numbers = #tpu.dot_dimension_numbers<[1], [0], [0], [1], [0, 0, 1, 1], [], []>} : vector<2x32xf32>, vector<32x128xf32>, vector<2x128xf32> -> vector<2x128xf32>
    %108 = vector.broadcast %5 : vector<1x128xf32> to vector<2x128xf32>
    %109 = arith.addf %107, %108 : vector<2x128xf32>
    %cst_21 = arith.constant dense<0.000000e+00> : vector<2x128xf32>
    %110 = tpu.matmul %87, %4, %cst_21 {dimension_numbers = #tpu.dot_dimension_numbers<[1], [0], [0], [1], [0, 0, 1, 1], [], []>} : vector<2x32xf32>, vector<32x128xf32>, vector<2x128xf32> -> vector<2x128xf32>
    %111 = arith.addf %109, %110 : vector<2x128xf32>
    %112 = vector.extract_strided_slice %111 {offsets = [0, 0], sizes = [2, 96], strides = [1, 1]} : vector<2x128xf32> to vector<2x96xf32>
    %113 = arith.negf %112 : vector<2x96xf32>
    %114 = math.exp %113 : vector<2x96xf32>
    %cst_22 = arith.constant 1.000000e+00 : f32
    %115 = vector.broadcast %cst_22 : f32 to vector<2x96xf32>
    %116 = arith.addf %115, %114 : vector<2x96xf32>
    %117 = arith.divf %115, %116 : vector<2x96xf32>
    %118 = vector.extract_strided_slice %111 {offsets = [0, 96], sizes = [2, 32], strides = [1, 1]} : vector<2x128xf32> to vector<2x32xf32>
    %119 = math.tanh %118 : vector<2x32xf32>
    %120 = vector.extract_strided_slice %117 {offsets = [0, 32], sizes = [2, 32], strides = [1, 1]} : vector<2x96xf32> to vector<2x32xf32>
    %121 = arith.mulf %120, %84 : vector<2x32xf32>
    %122 = vector.extract_strided_slice %117 {offsets = [0, 0], sizes = [2, 32], strides = [1, 1]} : vector<2x96xf32> to vector<2x32xf32>
    %123 = arith.mulf %122, %119 : vector<2x32xf32>
    %124 = arith.addf %121, %123 : vector<2x32xf32>
    %125 = vector.extract_strided_slice %117 {offsets = [0, 64], sizes = [2, 32], strides = [1, 1]} : vector<2x96xf32> to vector<2x32xf32>
    %126 = math.tanh %124 : vector<2x32xf32>
    %127 = arith.mulf %125, %126 : vector<2x32xf32>
    %128 = vector.extract_strided_slice %9 {offsets = [6, 0], sizes = [2, 128], strides = [1, 1]} : vector<16x128xf32> to vector<2x128xf32>
    %cst_23 = arith.constant dense<0.000000e+00> : vector<2x128xf32>
    %129 = tpu.matmul %106, %1, %cst_23 {dimension_numbers = #tpu.dot_dimension_numbers<[1], [0], [0], [1], [0, 0, 1, 1], [], []>} : vector<2x32xf32>, vector<32x128xf32>, vector<2x128xf32> -> vector<2x128xf32>
    %130 = arith.addf %128, %129 : vector<2x128xf32>
    %131 = vector.extract_strided_slice %130 {offsets = [0, 0], sizes = [2, 96], strides = [1, 1]} : vector<2x128xf32> to vector<2x96xf32>
    %132 = arith.negf %131 : vector<2x96xf32>
    %133 = math.exp %132 : vector<2x96xf32>
    %cst_24 = arith.constant 1.000000e+00 : f32
    %134 = vector.broadcast %cst_24 : f32 to vector<2x96xf32>
    %135 = arith.addf %134, %133 : vector<2x96xf32>
    %136 = arith.divf %134, %135 : vector<2x96xf32>
    %137 = vector.extract_strided_slice %130 {offsets = [0, 96], sizes = [2, 32], strides = [1, 1]} : vector<2x128xf32> to vector<2x32xf32>
    %138 = math.tanh %137 : vector<2x32xf32>
    %139 = vector.extract_strided_slice %136 {offsets = [0, 32], sizes = [2, 32], strides = [1, 1]} : vector<2x96xf32> to vector<2x32xf32>
    %140 = arith.mulf %139, %103 : vector<2x32xf32>
    %141 = vector.extract_strided_slice %136 {offsets = [0, 0], sizes = [2, 32], strides = [1, 1]} : vector<2x96xf32> to vector<2x32xf32>
    %142 = arith.mulf %141, %138 : vector<2x32xf32>
    %143 = arith.addf %140, %142 : vector<2x32xf32>
    %144 = vector.extract_strided_slice %136 {offsets = [0, 64], sizes = [2, 32], strides = [1, 1]} : vector<2x96xf32> to vector<2x32xf32>
    %145 = math.tanh %143 : vector<2x32xf32>
    %146 = arith.mulf %144, %145 : vector<2x32xf32>
    %cst_25 = arith.constant dense<0.000000e+00> : vector<2x128xf32>
    %147 = tpu.matmul %146, %3, %cst_25 {dimension_numbers = #tpu.dot_dimension_numbers<[1], [0], [0], [1], [0, 0, 1, 1], [], []>} : vector<2x32xf32>, vector<32x128xf32>, vector<2x128xf32> -> vector<2x128xf32>
    %148 = vector.broadcast %5 : vector<1x128xf32> to vector<2x128xf32>
    %149 = arith.addf %147, %148 : vector<2x128xf32>
    %cst_26 = arith.constant dense<0.000000e+00> : vector<2x128xf32>
    %150 = tpu.matmul %127, %4, %cst_26 {dimension_numbers = #tpu.dot_dimension_numbers<[1], [0], [0], [1], [0, 0, 1, 1], [], []>} : vector<2x32xf32>, vector<32x128xf32>, vector<2x128xf32> -> vector<2x128xf32>
    %151 = arith.addf %149, %150 : vector<2x128xf32>
    %152 = vector.extract_strided_slice %151 {offsets = [0, 0], sizes = [2, 96], strides = [1, 1]} : vector<2x128xf32> to vector<2x96xf32>
    %153 = arith.negf %152 : vector<2x96xf32>
    %154 = math.exp %153 : vector<2x96xf32>
    %cst_27 = arith.constant 1.000000e+00 : f32
    %155 = vector.broadcast %cst_27 : f32 to vector<2x96xf32>
    %156 = arith.addf %155, %154 : vector<2x96xf32>
    %157 = arith.divf %155, %156 : vector<2x96xf32>
    %158 = vector.extract_strided_slice %151 {offsets = [0, 96], sizes = [2, 32], strides = [1, 1]} : vector<2x128xf32> to vector<2x32xf32>
    %159 = math.tanh %158 : vector<2x32xf32>
    %160 = vector.extract_strided_slice %157 {offsets = [0, 32], sizes = [2, 32], strides = [1, 1]} : vector<2x96xf32> to vector<2x32xf32>
    %161 = arith.mulf %160, %124 : vector<2x32xf32>
    %162 = vector.extract_strided_slice %157 {offsets = [0, 0], sizes = [2, 32], strides = [1, 1]} : vector<2x96xf32> to vector<2x32xf32>
    %163 = arith.mulf %162, %159 : vector<2x32xf32>
    %164 = arith.addf %161, %163 : vector<2x32xf32>
    %165 = vector.extract_strided_slice %157 {offsets = [0, 64], sizes = [2, 32], strides = [1, 1]} : vector<2x96xf32> to vector<2x32xf32>
    %166 = math.tanh %164 : vector<2x32xf32>
    %167 = arith.mulf %165, %166 : vector<2x32xf32>
    %168 = vector.extract_strided_slice %9 {offsets = [8, 0], sizes = [2, 128], strides = [1, 1]} : vector<16x128xf32> to vector<2x128xf32>
    %cst_28 = arith.constant dense<0.000000e+00> : vector<2x128xf32>
    %169 = tpu.matmul %146, %1, %cst_28 {dimension_numbers = #tpu.dot_dimension_numbers<[1], [0], [0], [1], [0, 0, 1, 1], [], []>} : vector<2x32xf32>, vector<32x128xf32>, vector<2x128xf32> -> vector<2x128xf32>
    %170 = arith.addf %168, %169 : vector<2x128xf32>
    %171 = vector.extract_strided_slice %170 {offsets = [0, 0], sizes = [2, 96], strides = [1, 1]} : vector<2x128xf32> to vector<2x96xf32>
    %172 = arith.negf %171 : vector<2x96xf32>
    %173 = math.exp %172 : vector<2x96xf32>
    %cst_29 = arith.constant 1.000000e+00 : f32
    %174 = vector.broadcast %cst_29 : f32 to vector<2x96xf32>
    %175 = arith.addf %174, %173 : vector<2x96xf32>
    %176 = arith.divf %174, %175 : vector<2x96xf32>
    %177 = vector.extract_strided_slice %170 {offsets = [0, 96], sizes = [2, 32], strides = [1, 1]} : vector<2x128xf32> to vector<2x32xf32>
    %178 = math.tanh %177 : vector<2x32xf32>
    %179 = vector.extract_strided_slice %176 {offsets = [0, 32], sizes = [2, 32], strides = [1, 1]} : vector<2x96xf32> to vector<2x32xf32>
    %180 = arith.mulf %179, %143 : vector<2x32xf32>
    %181 = vector.extract_strided_slice %176 {offsets = [0, 0], sizes = [2, 32], strides = [1, 1]} : vector<2x96xf32> to vector<2x32xf32>
    %182 = arith.mulf %181, %178 : vector<2x32xf32>
    %183 = arith.addf %180, %182 : vector<2x32xf32>
    %184 = vector.extract_strided_slice %176 {offsets = [0, 64], sizes = [2, 32], strides = [1, 1]} : vector<2x96xf32> to vector<2x32xf32>
    %185 = math.tanh %183 : vector<2x32xf32>
    %186 = arith.mulf %184, %185 : vector<2x32xf32>
    %cst_30 = arith.constant dense<0.000000e+00> : vector<2x128xf32>
    %187 = tpu.matmul %186, %3, %cst_30 {dimension_numbers = #tpu.dot_dimension_numbers<[1], [0], [0], [1], [0, 0, 1, 1], [], []>} : vector<2x32xf32>, vector<32x128xf32>, vector<2x128xf32> -> vector<2x128xf32>
    %188 = vector.broadcast %5 : vector<1x128xf32> to vector<2x128xf32>
    %189 = arith.addf %187, %188 : vector<2x128xf32>
    %cst_31 = arith.constant dense<0.000000e+00> : vector<2x128xf32>
    %190 = tpu.matmul %167, %4, %cst_31 {dimension_numbers = #tpu.dot_dimension_numbers<[1], [0], [0], [1], [0, 0, 1, 1], [], []>} : vector<2x32xf32>, vector<32x128xf32>, vector<2x128xf32> -> vector<2x128xf32>
    %191 = arith.addf %189, %190 : vector<2x128xf32>
    %192 = vector.extract_strided_slice %191 {offsets = [0, 0], sizes = [2, 96], strides = [1, 1]} : vector<2x128xf32> to vector<2x96xf32>
    %193 = arith.negf %192 : vector<2x96xf32>
    %194 = math.exp %193 : vector<2x96xf32>
    %cst_32 = arith.constant 1.000000e+00 : f32
    %195 = vector.broadcast %cst_32 : f32 to vector<2x96xf32>
    %196 = arith.addf %195, %194 : vector<2x96xf32>
    %197 = arith.divf %195, %196 : vector<2x96xf32>
    %198 = vector.extract_strided_slice %191 {offsets = [0, 96], sizes = [2, 32], strides = [1, 1]} : vector<2x128xf32> to vector<2x32xf32>
    %199 = math.tanh %198 : vector<2x32xf32>
    %200 = vector.extract_strided_slice %197 {offsets = [0, 32], sizes = [2, 32], strides = [1, 1]} : vector<2x96xf32> to vector<2x32xf32>
    %201 = arith.mulf %200, %164 : vector<2x32xf32>
    %202 = vector.extract_strided_slice %197 {offsets = [0, 0], sizes = [2, 32], strides = [1, 1]} : vector<2x96xf32> to vector<2x32xf32>
    %203 = arith.mulf %202, %199 : vector<2x32xf32>
    %204 = arith.addf %201, %203 : vector<2x32xf32>
    %205 = vector.extract_strided_slice %197 {offsets = [0, 64], sizes = [2, 32], strides = [1, 1]} : vector<2x96xf32> to vector<2x32xf32>
    %206 = math.tanh %204 : vector<2x32xf32>
    %207 = arith.mulf %205, %206 : vector<2x32xf32>
    %208 = vector.extract_strided_slice %9 {offsets = [10, 0], sizes = [2, 128], strides = [1, 1]} : vector<16x128xf32> to vector<2x128xf32>
    %cst_33 = arith.constant dense<0.000000e+00> : vector<2x128xf32>
    %209 = tpu.matmul %186, %1, %cst_33 {dimension_numbers = #tpu.dot_dimension_numbers<[1], [0], [0], [1], [0, 0, 1, 1], [], []>} : vector<2x32xf32>, vector<32x128xf32>, vector<2x128xf32> -> vector<2x128xf32>
    %210 = arith.addf %208, %209 : vector<2x128xf32>
    %211 = vector.extract_strided_slice %210 {offsets = [0, 0], sizes = [2, 96], strides = [1, 1]} : vector<2x128xf32> to vector<2x96xf32>
    %212 = arith.negf %211 : vector<2x96xf32>
    %213 = math.exp %212 : vector<2x96xf32>
    %cst_34 = arith.constant 1.000000e+00 : f32
    %214 = vector.broadcast %cst_34 : f32 to vector<2x96xf32>
    %215 = arith.addf %214, %213 : vector<2x96xf32>
    %216 = arith.divf %214, %215 : vector<2x96xf32>
    %217 = vector.extract_strided_slice %210 {offsets = [0, 96], sizes = [2, 32], strides = [1, 1]} : vector<2x128xf32> to vector<2x32xf32>
    %218 = math.tanh %217 : vector<2x32xf32>
    %219 = vector.extract_strided_slice %216 {offsets = [0, 32], sizes = [2, 32], strides = [1, 1]} : vector<2x96xf32> to vector<2x32xf32>
    %220 = arith.mulf %219, %183 : vector<2x32xf32>
    %221 = vector.extract_strided_slice %216 {offsets = [0, 0], sizes = [2, 32], strides = [1, 1]} : vector<2x96xf32> to vector<2x32xf32>
    %222 = arith.mulf %221, %218 : vector<2x32xf32>
    %223 = arith.addf %220, %222 : vector<2x32xf32>
    %224 = vector.extract_strided_slice %216 {offsets = [0, 64], sizes = [2, 32], strides = [1, 1]} : vector<2x96xf32> to vector<2x32xf32>
    %225 = math.tanh %223 : vector<2x32xf32>
    %226 = arith.mulf %224, %225 : vector<2x32xf32>
    %cst_35 = arith.constant dense<0.000000e+00> : vector<2x128xf32>
    %227 = tpu.matmul %226, %3, %cst_35 {dimension_numbers = #tpu.dot_dimension_numbers<[1], [0], [0], [1], [0, 0, 1, 1], [], []>} : vector<2x32xf32>, vector<32x128xf32>, vector<2x128xf32> -> vector<2x128xf32>
    %228 = vector.broadcast %5 : vector<1x128xf32> to vector<2x128xf32>
    %229 = arith.addf %227, %228 : vector<2x128xf32>
    %cst_36 = arith.constant dense<0.000000e+00> : vector<2x128xf32>
    %230 = tpu.matmul %207, %4, %cst_36 {dimension_numbers = #tpu.dot_dimension_numbers<[1], [0], [0], [1], [0, 0, 1, 1], [], []>} : vector<2x32xf32>, vector<32x128xf32>, vector<2x128xf32> -> vector<2x128xf32>
    %231 = arith.addf %229, %230 : vector<2x128xf32>
    %232 = vector.extract_strided_slice %231 {offsets = [0, 0], sizes = [2, 96], strides = [1, 1]} : vector<2x128xf32> to vector<2x96xf32>
    %233 = arith.negf %232 : vector<2x96xf32>
    %234 = math.exp %233 : vector<2x96xf32>
    %cst_37 = arith.constant 1.000000e+00 : f32
    %235 = vector.broadcast %cst_37 : f32 to vector<2x96xf32>
    %236 = arith.addf %235, %234 : vector<2x96xf32>
    %237 = arith.divf %235, %236 : vector<2x96xf32>
    %238 = vector.extract_strided_slice %231 {offsets = [0, 96], sizes = [2, 32], strides = [1, 1]} : vector<2x128xf32> to vector<2x32xf32>
    %239 = math.tanh %238 : vector<2x32xf32>
    %240 = vector.extract_strided_slice %237 {offsets = [0, 32], sizes = [2, 32], strides = [1, 1]} : vector<2x96xf32> to vector<2x32xf32>
    %241 = arith.mulf %240, %204 : vector<2x32xf32>
    %242 = vector.extract_strided_slice %237 {offsets = [0, 0], sizes = [2, 32], strides = [1, 1]} : vector<2x96xf32> to vector<2x32xf32>
    %243 = arith.mulf %242, %239 : vector<2x32xf32>
    %244 = arith.addf %241, %243 : vector<2x32xf32>
    %245 = vector.extract_strided_slice %237 {offsets = [0, 64], sizes = [2, 32], strides = [1, 1]} : vector<2x96xf32> to vector<2x32xf32>
    %246 = math.tanh %244 : vector<2x32xf32>
    %247 = arith.mulf %245, %246 : vector<2x32xf32>
    %248 = vector.extract_strided_slice %9 {offsets = [12, 0], sizes = [2, 128], strides = [1, 1]} : vector<16x128xf32> to vector<2x128xf32>
    %cst_38 = arith.constant dense<0.000000e+00> : vector<2x128xf32>
    %249 = tpu.matmul %226, %1, %cst_38 {dimension_numbers = #tpu.dot_dimension_numbers<[1], [0], [0], [1], [0, 0, 1, 1], [], []>} : vector<2x32xf32>, vector<32x128xf32>, vector<2x128xf32> -> vector<2x128xf32>
    %250 = arith.addf %248, %249 : vector<2x128xf32>
    %251 = vector.extract_strided_slice %250 {offsets = [0, 0], sizes = [2, 96], strides = [1, 1]} : vector<2x128xf32> to vector<2x96xf32>
    %252 = arith.negf %251 : vector<2x96xf32>
    %253 = math.exp %252 : vector<2x96xf32>
    %cst_39 = arith.constant 1.000000e+00 : f32
    %254 = vector.broadcast %cst_39 : f32 to vector<2x96xf32>
    %255 = arith.addf %254, %253 : vector<2x96xf32>
    %256 = arith.divf %254, %255 : vector<2x96xf32>
    %257 = vector.extract_strided_slice %250 {offsets = [0, 96], sizes = [2, 32], strides = [1, 1]} : vector<2x128xf32> to vector<2x32xf32>
    %258 = math.tanh %257 : vector<2x32xf32>
    %259 = vector.extract_strided_slice %256 {offsets = [0, 32], sizes = [2, 32], strides = [1, 1]} : vector<2x96xf32> to vector<2x32xf32>
    %260 = arith.mulf %259, %223 : vector<2x32xf32>
    %261 = vector.extract_strided_slice %256 {offsets = [0, 0], sizes = [2, 32], strides = [1, 1]} : vector<2x96xf32> to vector<2x32xf32>
    %262 = arith.mulf %261, %258 : vector<2x32xf32>
    %263 = arith.addf %260, %262 : vector<2x32xf32>
    %264 = vector.extract_strided_slice %256 {offsets = [0, 64], sizes = [2, 32], strides = [1, 1]} : vector<2x96xf32> to vector<2x32xf32>
    %265 = math.tanh %263 : vector<2x32xf32>
    %266 = arith.mulf %264, %265 : vector<2x32xf32>
    %cst_40 = arith.constant dense<0.000000e+00> : vector<2x128xf32>
    %267 = tpu.matmul %266, %3, %cst_40 {dimension_numbers = #tpu.dot_dimension_numbers<[1], [0], [0], [1], [0, 0, 1, 1], [], []>} : vector<2x32xf32>, vector<32x128xf32>, vector<2x128xf32> -> vector<2x128xf32>
    %268 = vector.broadcast %5 : vector<1x128xf32> to vector<2x128xf32>
    %269 = arith.addf %267, %268 : vector<2x128xf32>
    %cst_41 = arith.constant dense<0.000000e+00> : vector<2x128xf32>
    %270 = tpu.matmul %247, %4, %cst_41 {dimension_numbers = #tpu.dot_dimension_numbers<[1], [0], [0], [1], [0, 0, 1, 1], [], []>} : vector<2x32xf32>, vector<32x128xf32>, vector<2x128xf32> -> vector<2x128xf32>
    %271 = arith.addf %269, %270 : vector<2x128xf32>
    %272 = vector.extract_strided_slice %271 {offsets = [0, 0], sizes = [2, 96], strides = [1, 1]} : vector<2x128xf32> to vector<2x96xf32>
    %273 = arith.negf %272 : vector<2x96xf32>
    %274 = math.exp %273 : vector<2x96xf32>
    %cst_42 = arith.constant 1.000000e+00 : f32
    %275 = vector.broadcast %cst_42 : f32 to vector<2x96xf32>
    %276 = arith.addf %275, %274 : vector<2x96xf32>
    %277 = arith.divf %275, %276 : vector<2x96xf32>
    %278 = vector.extract_strided_slice %271 {offsets = [0, 96], sizes = [2, 32], strides = [1, 1]} : vector<2x128xf32> to vector<2x32xf32>
    %279 = math.tanh %278 : vector<2x32xf32>
    %280 = vector.extract_strided_slice %277 {offsets = [0, 32], sizes = [2, 32], strides = [1, 1]} : vector<2x96xf32> to vector<2x32xf32>
    %281 = arith.mulf %280, %244 : vector<2x32xf32>
    %282 = vector.extract_strided_slice %277 {offsets = [0, 0], sizes = [2, 32], strides = [1, 1]} : vector<2x96xf32> to vector<2x32xf32>
    %283 = arith.mulf %282, %279 : vector<2x32xf32>
    %284 = arith.addf %281, %283 : vector<2x32xf32>
    %285 = vector.extract_strided_slice %277 {offsets = [0, 64], sizes = [2, 32], strides = [1, 1]} : vector<2x96xf32> to vector<2x32xf32>
    %286 = math.tanh %284 : vector<2x32xf32>
    %287 = arith.mulf %285, %286 : vector<2x32xf32>
    %288 = vector.extract_strided_slice %9 {offsets = [14, 0], sizes = [2, 128], strides = [1, 1]} : vector<16x128xf32> to vector<2x128xf32>
    %cst_43 = arith.constant dense<0.000000e+00> : vector<2x128xf32>
    %289 = tpu.matmul %266, %1, %cst_43 {dimension_numbers = #tpu.dot_dimension_numbers<[1], [0], [0], [1], [0, 0, 1, 1], [], []>} : vector<2x32xf32>, vector<32x128xf32>, vector<2x128xf32> -> vector<2x128xf32>
    %290 = arith.addf %288, %289 : vector<2x128xf32>
    %291 = vector.extract_strided_slice %290 {offsets = [0, 0], sizes = [2, 96], strides = [1, 1]} : vector<2x128xf32> to vector<2x96xf32>
    %292 = arith.negf %291 : vector<2x96xf32>
    %293 = math.exp %292 : vector<2x96xf32>
    %cst_44 = arith.constant 1.000000e+00 : f32
    %294 = vector.broadcast %cst_44 : f32 to vector<2x96xf32>
    %295 = arith.addf %294, %293 : vector<2x96xf32>
    %296 = arith.divf %294, %295 : vector<2x96xf32>
    %297 = vector.extract_strided_slice %290 {offsets = [0, 96], sizes = [2, 32], strides = [1, 1]} : vector<2x128xf32> to vector<2x32xf32>
    %298 = math.tanh %297 : vector<2x32xf32>
    %299 = vector.extract_strided_slice %296 {offsets = [0, 32], sizes = [2, 32], strides = [1, 1]} : vector<2x96xf32> to vector<2x32xf32>
    %300 = arith.mulf %299, %263 : vector<2x32xf32>
    %301 = vector.extract_strided_slice %296 {offsets = [0, 0], sizes = [2, 32], strides = [1, 1]} : vector<2x96xf32> to vector<2x32xf32>
    %302 = arith.mulf %301, %298 : vector<2x32xf32>
    %303 = arith.addf %300, %302 : vector<2x32xf32>
    %304 = vector.extract_strided_slice %296 {offsets = [0, 64], sizes = [2, 32], strides = [1, 1]} : vector<2x96xf32> to vector<2x32xf32>
    %305 = math.tanh %303 : vector<2x32xf32>
    %306 = arith.mulf %304, %305 : vector<2x32xf32>
    %cst_45 = arith.constant dense<0.000000e+00> : vector<2x128xf32>
    %307 = tpu.matmul %306, %3, %cst_45 {dimension_numbers = #tpu.dot_dimension_numbers<[1], [0], [0], [1], [0, 0, 1, 1], [], []>} : vector<2x32xf32>, vector<32x128xf32>, vector<2x128xf32> -> vector<2x128xf32>
    %308 = vector.broadcast %5 : vector<1x128xf32> to vector<2x128xf32>
    %309 = arith.addf %307, %308 : vector<2x128xf32>
    %cst_46 = arith.constant dense<0.000000e+00> : vector<2x128xf32>
    %310 = tpu.matmul %287, %4, %cst_46 {dimension_numbers = #tpu.dot_dimension_numbers<[1], [0], [0], [1], [0, 0, 1, 1], [], []>} : vector<2x32xf32>, vector<32x128xf32>, vector<2x128xf32> -> vector<2x128xf32>
    %311 = arith.addf %309, %310 : vector<2x128xf32>
    %312 = vector.extract_strided_slice %311 {offsets = [0, 0], sizes = [2, 96], strides = [1, 1]} : vector<2x128xf32> to vector<2x96xf32>
    %313 = arith.negf %312 : vector<2x96xf32>
    %314 = math.exp %313 : vector<2x96xf32>
    %cst_47 = arith.constant 1.000000e+00 : f32
    %315 = vector.broadcast %cst_47 : f32 to vector<2x96xf32>
    %316 = arith.addf %315, %314 : vector<2x96xf32>
    %317 = arith.divf %315, %316 : vector<2x96xf32>
    %318 = vector.extract_strided_slice %311 {offsets = [0, 96], sizes = [2, 32], strides = [1, 1]} : vector<2x128xf32> to vector<2x32xf32>
    %319 = math.tanh %318 : vector<2x32xf32>
    %320 = vector.extract_strided_slice %317 {offsets = [0, 32], sizes = [2, 32], strides = [1, 1]} : vector<2x96xf32> to vector<2x32xf32>
    %321 = arith.mulf %320, %284 : vector<2x32xf32>
    %322 = vector.extract_strided_slice %317 {offsets = [0, 0], sizes = [2, 32], strides = [1, 1]} : vector<2x96xf32> to vector<2x32xf32>
    %323 = arith.mulf %322, %319 : vector<2x32xf32>
    %324 = arith.addf %321, %323 : vector<2x32xf32>
    %325 = vector.extract_strided_slice %317 {offsets = [0, 64], sizes = [2, 32], strides = [1, 1]} : vector<2x96xf32> to vector<2x32xf32>
    %326 = math.tanh %324 : vector<2x32xf32>
    %327 = arith.mulf %325, %326 : vector<2x32xf32>
    %c0_48 = arith.constant 0 : index
    %c0_49 = arith.constant 0 : index
    %328 = vector.load %arg2[%c0_48, %c0_49] : memref<64x16xf32, #tpu.memory_space<vmem>>, vector<32x16xf32>
    %c32 = arith.constant 32 : index
    %c0_50 = arith.constant 0 : index
    %329 = vector.load %arg2[%c32, %c0_50] : memref<64x16xf32, #tpu.memory_space<vmem>>, vector<1x16xf32>
    %c40_51 = arith.constant 40 : index
    %c0_52 = arith.constant 0 : index
    %330 = vector.load %arg2[%c40_51, %c0_52] : memref<64x16xf32, #tpu.memory_space<vmem>>, vector<16x16xf32>
    %c56 = arith.constant 56 : index
    %c0_53 = arith.constant 0 : index
    %331 = vector.load %arg2[%c56, %c0_53] : memref<64x16xf32, #tpu.memory_space<vmem>>, vector<1x16xf32>
    %cst_54 = arith.constant dense<0.000000e+00> : vector<2x16xf32>
    %332 = tpu.matmul %327, %328, %cst_54 {dimension_numbers = #tpu.dot_dimension_numbers<[1], [0], [0], [1], [0, 0, 1, 1], [], []>} : vector<2x32xf32>, vector<32x16xf32>, vector<2x16xf32> -> vector<2x16xf32>
    %333 = vector.broadcast %329 : vector<1x16xf32> to vector<2x16xf32>
    %334 = arith.addf %332, %333 : vector<2x16xf32>
    %cst_55 = arith.constant 0.000000e+00 : f32
    %335 = vector.broadcast %cst_55 : f32 to vector<2x16xf32>
    %336 = arith.maximumf %334, %335 : vector<2x16xf32>
    %cst_56 = arith.constant dense<0.000000e+00> : vector<2x16xf32>
    %337 = tpu.matmul %336, %330, %cst_56 {dimension_numbers = #tpu.dot_dimension_numbers<[1], [0], [0], [1], [0, 0, 1, 1], [], []>} : vector<2x16xf32>, vector<16x16xf32>, vector<2x16xf32> -> vector<2x16xf32>
    %338 = vector.broadcast %331 : vector<1x16xf32> to vector<2x16xf32>
    %339 = arith.addf %337, %338 : vector<2x16xf32>
    %340 = vector.extract_strided_slice %339 {offsets = [0, 0], sizes = [2, 2], strides = [1, 1]} : vector<2x16xf32> to vector<2x2xf32>
    %c0_57 = arith.constant 0 : index
    %c0_58 = arith.constant 0 : index
    %341 = vector.load %arg3[%c0_57, %c0_58] : memref<2x2xf32, #tpu.memory_space<vmem>>, vector<2x2xf32>
    tpu.vector_store %arg3[%c0_57, %c0_58], %340 {strides = array<i32>} : memref<2x2xf32, #tpu.memory_space<vmem>>, vector<2x2xf32>,
    return
  }
}

</mosaic_0001>

<bundles_post_ra>
// kernel: simple_model_forward.1
= control target key start
LH: loop header
LB: loop body
LE: loop exit
PB: predicated region body
PF: predicated region fallthrough
CT: control target
= control target key end

     0   :  { %8 = vsyncpa [#allocation3], 0  ;;  %s3558_s0 = inlined_call_operand.vmem [shape: f32[16,5], index: 0, kind: input, shape index: {}]   ;;  %s3559_s1 = inlined_call_operand.hbm [shape: f32[120,128], index: 1, kind: input, shape index: {}]   ;;  %s3560_s2 = inlined_call_operand.vmem [shape: f32[64,16], index: 2, kind: input, shape index: {}]   ;;  %s3561_s3 = inlined_call_operand.hbm [shape: f32[2,2], index: 3, kind: output, shape index: {}]  }
   0x1   :  { %9 = vsyncpa [#allocation4], 0  ;;  %s3162_s12 = smov [#allocation2]   ;;  %s3114_s16 = scalar_lea.hbm %s3559_s1, 1920 }
   0x2   :  { %s17_s13 = sshll.u32 %s3162_s12, 4  ;;  %p3115_p0 = scmp.ne.s32.totalorder %s3559_s1, %s3114_s16  ;;  %s18_s13 = int_to_ptr.vmem [resolvable:$true] %s17_s13 }
   0x3   :  { %p3118_p1 = scmp.lt.u32.totalorder %s3114_s16, %s3559_s1 }
   0x5   :  { %p3120_p2 = pnand %p3118_p1, %p3115_p0 }
   0x7   :  { %3123 = shalt.err (!%p3120_p2)
}
   0x8   :  { %s3124_s21 = scalar_lea.vmem %s18_s13, 1920  ;;  %p3129_p4 = scmp.lt.s32.totalorder %s18_s13, %s18_s13 }
   0x9   :  { %p3125_p3 = scmp.ne.s32.totalorder %s18_s13, %s3124_s21  ;;  %p3130_p5 = scmp.lt.s32.totalorder %s3124_s21, %s3124_s21 }
   0xb   :  { %p3131_p6 = por %p3130_p5, %p3129_p4 }
   0xd   :  { %p3132_p7 = pnand %p3131_p6, %p3125_p3 }
   0xf   :  { %3135 = shalt.err (!%p3132_p7)
}
  0x10   :  { %s3163_s22 = smov 128   ;;  %s3164_s23 = smov 8  }
  0x11   :  { %23 = dma.hbm_to_vmem [thread:$0]  %s3559_s1, 1920, %s18_s13, [#allocation3], %s3163_s22, %s3163_s22, %s3164_s23  }
  0x12   :  { %3158 = dma.done.wait [#allocation3], 1920  }
  0x13   :  { %3159 = vsyncadd [#allocation3], 4294965376  ;;  %vm57_vm0 = vcmask 1044480   ;;  %vm50_vm1 = vcmask 39936   ;;  %v29_v0 = vld [vmem:[#allocation2] sm:$0x1f] }
  0x14   :  { %v44_v1 = vld [vmem:[%s3558_s0] sm:$0xff]  ;;  %v45_v2 = vld [vmem:[%s3558_s0 + $0x8] sm:$0xff]  ;;  %2550 = vmatprep.subr.msk.mxu0 %vm57_vm0, %v29_v0  ;;  %s3165_s1 = smov 32   ;;  %v35_v18 = vld [vmem:[#allocation2 + $0x30] sm:$0xff]  ;;  %v3166_v21 = vmov 0.0|0.0   ;;  %vm3167_vm2 = vmmov 0  }
  0x15   :  { %2552 = vmatprep.mubr.msk.f32.mxu0 %vm50_vm1, %v44_v1  ;;  %2551 = vmatpush3.msk.msra.mxu0 %vm57_vm0, %v29_v0  ;;  %v2382_v3 = vld [vmem:[#allocation2 + $0x28] ss:$0 sm:$0xff]  ;;  %v36_v19 = vld [vmem:[#allocation2 + $0x38] sm:$0xff]  ;;  %v31_v23 = vld [vmem:[#allocation2 + $0x10] sm:$0xff]  ;;  %v3168_v29 = vmov 0.0   ;;  %s3169_s0 = smov 64  }
  0x16   :  { %2553 = vmatmul.mubr.msk.f32.vlgmr.msra.gmra.mrb[0].mxu0 %vm50_vm1, %v45_v2  ;;  %v30_v20 = vld [vmem:[#allocation2 + $0x8] sm:$0xff]  ;;  %2815 = vmatprep.subr.bf16.mxu1 %v3166_v21  ;;  %v3222_v22 = vpack.c.bf16 %v36_v19, %v35_v18  ;;  %v37_v24 = vld [vmem:[#allocation2 + $0x40] sm:$0xff]  ;;  %v32_v27 = vld [vmem:[#allocation2 + $0x18] sm:$0xff]  ;;  %vm167_vm3 = vcmask 261120   ;;  %vm2291_vm4 = vcmask 130048   ;;  %s3170_s19 = smov [#allocation5]  }
  0x17   :  { %2821 = vmatprep.subr.bf16.mxu0 %v3166_v21  ;;  %v38_v25 = vld [vmem:[#allocation2 + $0x48] sm:$0xff]  ;;  %v3224_v26 = vpack.c.bf16 %v31_v23, %v30_v20  ;;  %v33_v28 = vld [vmem:[#allocation2 + $0x20] sm:$0xff]  ;;  %2563 = vmatprep.mubr.msk.f32.mxu1 %vm3167_vm2, %v3168_v29  ;;  %v3258_v36 = vld [vmem:[#allocation2 + $0x70] ss:$0 sm:$0xff]  ;;  %s2373_s20 = sshll.u32 %s3170_s19, 4  ;;  %vm2365_vm5 = vcmask 9216   ;;  %s2374_s20 = int_to_ptr.vmem [resolvable:$true] %s2373_s20 }
  0x18   :  { %2574 = vmatprep.mubr.msk.f32.mxu0 %vm3167_vm2, %v3168_v29  ;;  %2817 = vmatpush3.bf16.msra.mxu1 %v3222_v22  ;;  %v3231_v30 = vpack.c.bf16 %v38_v25, %v37_v24  ;;  %v3235_v31 = vpack.c.bf16 %v33_v28, %v32_v27  ;;  %s3136_s21 = scalar_lea.vmem %s2374_s20, 32  ;;  %p3141_p9 = scmp.lt.s32.totalorder %s2374_s20, %s2374_s20 }
  0x19   :  { %2823 = vmatpush3.bf16.msra.mxu0 %v3224_v26  ;;  %2818 = vmatprep.subr.bf16.mxu1 %v3166_v21  ;;  %p3137_p8 = scmp.ne.s32.totalorder %s2374_s20, %s3136_s21  ;;  %p3142_p10 = scmp.lt.s32.totalorder %s3136_s21, %s3136_s21 }
  0x1a   :  { %2824 = vmatprep.subr.bf16.mxu0 %v3166_v21 }
  0x1b   :  { %p3143_p11 = por %p3142_p10, %p3141_p9 }
  0x1c   :  { %2820 = vmatpush3.bf16.msra.mxu1 %v3231_v30 }
  0x1d   :  { %2826 = vmatpush3.bf16.msra.mxu0 %v3235_v31  ;;  %2827 = vmatprep.subr.bf16.mxu1 %v3166_v21  ;;  %p3144_p12 = pnand %p3143_p11, %p3137_p8 }
  0x1e   :  { %2839 = vmatprep.subr.bf16.mxu0 %v3166_v21 }
  0xe9   :  { %v2554_v4 = vpop.f32.mrb[0].mxu0 }
  0xea   :  { %v3209_v5 = vadd.f32 %v2554_v4, %v2382_v3  ;;  %v127_v6 = vpop.f32.mrb[1].mxu0 }
  0xeb   :  { %v3211_v7 = vadd.f32 %v2382_v3, %v127_v6 }
  0xed   :  { %2986 = vtanh.f32 %v3211_v7  ;;  %v2386_v9 = vmul.f32 -1.442695, %v3211_v7 }
  0xef   :  { %2988 = vpow2.f32 %v2386_v9 }
  0xf7   :  { %v2987_v8 = vpop.eup %2986 }
  0xf8   :  { %145 = vrot.lane.b32.xlu0 %v2987_v8, %s3165_s1 }
  0xf9   :  { %v2989_v10 = vpop.eup %2988 }
  0xfa   :  { %v139_v11 = vadd.f32 1.0, %v2989_v10  ;;  %v39_v10 = vld [vmem:[#allocation2 + $0x50] sm:$0xff] }
  0xfc   :  { %2990 = vrcp.f32 %v139_v11  ;;  %v40_v11 = vld [vmem:[#allocation2 + $0x58] sm:$0xff] }
 0x106   :  { %v2991_v12 = vpop.eup %2990 }
 0x107   :  { %v143_v15 = vmul.f32 0.0, %v2991_v12 }
 0x16a   :  { %v146_v13 = vpop.permute.xlu0 %145 }
 0x16b   :  { %v148_v14 = vmul.f32 %v2991_v12, %v146_v13  ;;  %v41_v13 = vld [vmem:[#allocation2 + $0x60] sm:$0xff] }
 0x16d   :  { %150 = vrot.lane.b32.xlu0 %v148_v14, %s3165_s1  ;;  %v42_v14 = vld [vmem:[#allocation2 + $0x68] sm:$0xff] }
 0x1df   :  { %v151_v16 = vpop.permute.xlu0 %150 }
 0x1e0   :  { %v3217_v17 = vadd.f32 %v151_v16, %v143_v15  ;;  %v3282_v16 = vpack.c.bf16 %v42_v14, %v41_v13 }
 0x1e2   :  { %2992 = vtanh.f32 %v3217_v17  ;;  %v346_v59 = vrot.slane %v3217_v17, 6 }
 0x1ec   :  { %v2993_v32 = vpop.eup %2992 }
 0x1ed   :  { %156 = vrot.lane.b32.xlu1 %v2993_v32, %s3165_s1 }
 0x25f   :  { %v157_v33 = vpop.permute.xlu1 %156 }
 0x260   :  { %v159_v34 = vmul.f32 %v2991_v12, %v157_v33  ;;  %v3277_v12 = vpack.c.bf16 %v40_v11, %v39_v10 }
 0x262   :  { %165 = vrot.lane.b32.xlu1 %v159_v34, %s3169_s0 }
 0x2d4   :  { %v166_v35 = vpop.permute.xlu1 %165 }
 0x2d5   :  { %2564 = vmatmul.mubr.msk.f32.vlgmr.msra.gmra.mrb[0].mxu1 %vm167_vm3, %v166_v35  ;;  %2575 = vmatmul.mubr.msk.f32.vlgmr.msra.gmra.mrb[2].mxu0 %vm167_vm3, %v166_v35 }
 0x2d6   :  { %2829 = vmatpush3.bf16.msra.mxu1 %v3222_v22  ;;  %2841 = vmatpush3.bf16.msra.mxu0 %v3224_v26 }
 0x2d7   :  { %2830 = vmatprep.subr.bf16.mxu1 %v3166_v21  ;;  %2842 = vmatprep.subr.bf16.mxu0 %v3166_v21 }
 0x2d8   :  { %2607 = vmatprep.mubr.msk.f32.mxu0 %vm3167_vm2, %v3168_v29  ;;  %2585 = vmatprep.mubr.msk.f32.mxu1 %vm3167_vm2, %v3168_v29 }
 0x2da   :  { %2832 = vmatpush3.bf16.msra.mxu1 %v3231_v30  ;;  %2844 = vmatpush3.bf16.msra.mxu0 %v3235_v31 }
 0x2db   :  { %2833 = vmatprep.subr.bf16.mxu1 %v3166_v21  ;;  %2845 = vmatprep.subr.bf16.mxu0 %v3166_v21 }
 0x3a8   :  { %v236_v37 = vpop.f32.mrb[0].mxu1  ;;  %v330_v38 = vpop.f32.mrb[2].mxu0 }
 0x3a9   :  { %v237_v39 = vadd.f32 %v3258_v36, %v236_v37  ;;  %v335_v40 = vrot.slane %v330_v38, 6  ;;  %v2565_v41 = vpop.f32.mrb[1].mxu1  ;;  %v2576_v42 = vpop.f32.mrb[3].mxu0 }
 0x3ab   :  { %2994 = vtanh.f32 %v237_v39  ;;  %v337_v43 = vadd.f32 %v335_v40, %v3211_v7  ;;  %v2389_v46 = vmul.f32 -1.442695, %v237_v39 }
 0x3ad   :  { %2996 = vtanh.f32 %v337_v43  ;;  %v2391_v47 = vmul.f32 -1.442695, %v337_v43 }
 0x3ae   :  { %2998 = vpow2.f32 %v2389_v46 }
 0x3af   :  { %3000 = vpow2.f32 %v2391_v47 }
 0x3b5   :  { %v2995_v44 = vpop.eup %2994 }
 0x3b6   :  { %249 = vrot.lane.b32.xlu1 %v2995_v44, %s3165_s1 }
 0x3b7   :  { %v2997_v45 = vpop.eup %2996 }
 0x3b8   :  { %350 = vrot.lane.b32.xlu0 %v2997_v45, %s3165_s1  ;;  %v2999_v48 = vpop.eup %2998 }
 0x3b9   :  { %v3001_v49 = vpop.eup %3000  ;;  %v243_v50 = vadd.f32 1.0, %v2999_v48 }
 0x3ba   :  { %v341_v51 = vadd.f32 1.0, %v3001_v49 }
 0x3bb   :  { %3002 = vrcp.f32 %v243_v50 }
 0x3bc   :  { %3004 = vrcp.f32 %v341_v51 }
 0x3c5   :  { %v3003_v52 = vpop.eup %3002 }
 0x3c6   :  { %v3005_v55 = vpop.eup %3004  ;;  %v247_v58 = vmul.f32 0.0, %v3003_v52 }
 0x3c7   :  { %v348_v62 = vmul.f32 %v3005_v55, %v346_v59 }
 0x428   :  { %v250_v53 = vpop.permute.xlu1 %249 }
 0x429   :  { %v252_v54 = vmul.f32 %v3003_v52, %v250_v53 }
 0x42a   :  { %v351_v56 = vpop.permute.xlu0 %350 }
 0x42b   :  { %254 = vrot.lane.b32.xlu1 %v252_v54, %s3165_s1  ;;  %v353_v57 = vmul.f32 %v3005_v55, %v351_v56 }
 0x42d   :  { %355 = vrot.lane.b32.xlu0 %v353_v57, %s3165_s1 }
 0x49d   :  { %v255_v60 = vpop.permute.xlu1 %254 }
 0x49e   :  { %v3267_v61 = vadd.f32 %v255_v60, %v247_v58 }
 0x49f   :  { %v356_v63 = vpop.permute.xlu0 %355 }
 0x4a0   :  { %3006 = vtanh.f32 %v3267_v61  ;;  %v3270_v0 = vadd.f32 %v356_v63, %v348_v62 }
 0x4a2   :  { %3008 = vtanh.f32 %v3270_v0  ;;  %v623_v46 = vrot.slane %v3270_v0, 6 }
 0x4aa   :  { %v3007_v1 = vpop.eup %3006 }
 0x4ab   :  { %260 = vrot.lane.b32.xlu1 %v3007_v1, %s3165_s1 }
 0x4ac   :  { %v3009_v2 = vpop.eup %3008 }
 0x4ad   :  { %361 = vrot.lane.b32.xlu0 %v3009_v2, %s3165_s1 }
 0x51d   :  { %v261_v3 = vpop.permute.xlu1 %260 }
 0x51e   :  { %v263_v4 = vmul.f32 %v3003_v52, %v261_v3 }
 0x51f   :  { %v362_v6 = vpop.permute.xlu0 %361 }
 0x520   :  { %442 = vrot.lane.b32.xlu1 %v263_v4, %s3169_s0  ;;  %v364_v8 = vmul.f32 %v3005_v55, %v362_v6 }
 0x522   :  { %v366_v9 = vrot.slane %v364_v8, 2 }
 0x524   :  { %367 = vrot.lane.b32.xlu0 %v366_v9, %s3169_s0 }
 0x592   :  { %v443_v17 = vpop.permute.xlu1 %442 }
 0x596   :  { %v368_v15 = vpop.permute.xlu0 %367 }
 0x597   :  { %2586 = vmatmul.mubr.msk.f32.vlgmr.msra.gmra.mrb[2].mxu1 %vm167_vm3, %v368_v15  ;;  %2608 = vmatmul.mubr.msk.f32.vlgmr.msra.gmra.mrb[4].mxu0 %vm167_vm3, %v368_v15 }
 0x598   :  { %2835 = vmatpush3.bf16.msra.mxu1 %v3277_v12  ;;  %2596 = vmatprep.mubr.msk.f32.mxu1 %vm3167_vm2, %v3168_v29 }
 0x599   :  { %2836 = vmatprep.subr.bf16.mxu1 %v3166_v21  ;;  %2847 = vmatpush3.bf16.msra.mxu0 %v3222_v22 }
 0x59a   :  { %2848 = vmatprep.subr.bf16.mxu0 %v3166_v21  ;;  %2618 = vmatprep.mubr.msk.f32.mxu0 %vm3167_vm2, %v3168_v29 }
 0x59c   :  { %2838 = vmatpush3.bf16.msra.mxu1 %v3282_v16 }
 0x59d   :  { %2857 = vmatprep.subr.bf16.mxu1 %v3166_v21  ;;  %2850 = vmatpush3.bf16.msra.mxu0 %v3231_v30 }
 0x59e   :  { %2851 = vmatprep.subr.bf16.mxu0 %v3166_v21 }
 0x59f   :  { %2597 = vmatmul.mubr.msk.f32.vlgmr.msra.gmra.mrb[2].mxu1 %vm167_vm3, %v443_v17 }
 0x5a0   :  { %2859 = vmatpush3.bf16.msra.mxu1 %v3224_v26  ;;  %2640 = vmatprep.mubr.msk.f32.mxu1 %vm3167_vm2, %v3168_v29 }
 0x5a1   :  { %2860 = vmatprep.subr.bf16.mxu1 %v3166_v21 }
 0x5a4   :  { %2862 = vmatpush3.bf16.msra.mxu1 %v3235_v31 }
 0x5a5   :  { %2863 = vmatprep.subr.bf16.mxu1 %v3166_v21 }
 0x66a   :  { %v607_v18 = vpop.f32.mrb[4].mxu0 }
 0x66b   :  { %v612_v19 = vrot.slane %v607_v18, 4  ;;  %v2609_v20 = vpop.f32.mrb[5].mxu0 }
 0x66d   :  { %v614_v23 = vadd.f32 %v612_v19, %v3211_v7 }
 0x66f   :  { %3010 = vtanh.f32 %v614_v23  ;;  %v2396_v33 = vmul.f32 -1.442695, %v614_v23 }
 0x672   :  { %v512_v24 = vpop.f32.mrb[2].mxu1 }
 0x673   :  { %v2956_v25 = vadd.f32 %v3258_v36, %v512_v24  ;;  %v2598_v27 = vpop.f32.mrb[3].mxu1 }
 0x675   :  { %3012 = vtanh.f32 %v2956_v25  ;;  %v2394_v34 = vmul.f32 -1.442695, %v2956_v25 }
 0x676   :  { %3014 = vpow2.f32 %v2396_v33 }
 0x677   :  { %3016 = vpow2.f32 %v2394_v34 }
 0x679   :  { %v3011_v28 = vpop.eup %3010 }
 0x67a   :  { %627 = vrot.lane.b32.xlu0 %v3011_v28, %s3165_s1 }
 0x67f   :  { %v3013_v32 = vpop.eup %3012 }
 0x680   :  { %526 = vrot.lane.b32.xlu1 %v3013_v32, %s3165_s1  ;;  %v3015_v35 = vpop.eup %3014 }
 0x681   :  { %v618_v37 = vadd.f32 1.0, %v3015_v35  ;;  %v3017_v38 = vpop.eup %3016 }
 0x682   :  { %v520_v39 = vadd.f32 1.0, %v3017_v38 }
 0x683   :  { %3018 = vrcp.f32 %v618_v37 }
 0x684   :  { %3020 = vrcp.f32 %v520_v39 }
 0x68d   :  { %v3019_v40 = vpop.eup %3018 }
 0x68e   :  { %v3021_v43 = vpop.eup %3020  ;;  %v625_v47 = vmul.f32 %v3019_v40, %v623_v46 }
 0x68f   :  { %v524_v50 = vmul.f32 %v3021_v43, %v3267_v61 }
 0x6ec   :  { %v628_v41 = vpop.permute.xlu0 %627 }
 0x6ed   :  { %v630_v42 = vmul.f32 %v3019_v40, %v628_v41 }
 0x6ef   :  { %632 = vrot.lane.b32.xlu0 %v630_v42, %s3165_s1 }
 0x6f2   :  { %v527_v44 = vpop.permute.xlu1 %526 }
 0x6f3   :  { %v529_v45 = vmul.f32 %v3021_v43, %v527_v44 }
 0x6f5   :  { %531 = vrot.lane.b32.xlu1 %v529_v45, %s3165_s1 }
 0x761   :  { %v633_v48 = vpop.permute.xlu0 %632 }
 0x762   :  { %v3309_v49 = vadd.f32 %v633_v48, %v625_v47 }
 0x764   :  { %3022 = vtanh.f32 %v3309_v49  ;;  %v900_v24 = vrot.slane %v3309_v49, 6 }
 0x767   :  { %v532_v51 = vpop.permute.xlu1 %531 }
 0x768   :  { %v3313_v52 = vadd.f32 %v532_v51, %v524_v50 }
 0x76a   :  { %3024 = vtanh.f32 %v3313_v52 }
 0x76e   :  { %v3023_v53 = vpop.eup %3022 }
 0x76f   :  { %638 = vrot.lane.b32.xlu0 %v3023_v53, %s3165_s1 }
 0x774   :  { %v3025_v54 = vpop.eup %3024 }
 0x775   :  { %537 = vrot.lane.b32.xlu1 %v3025_v54, %s3165_s1 }
 0x7e1   :  { %v639_v55 = vpop.permute.xlu0 %638 }
 0x7e2   :  { %v641_v56 = vmul.f32 %v3019_v40, %v639_v55 }
 0x7e4   :  { %v643_v57 = vrot.slane %v641_v56, 4 }
 0x7e6   :  { %644 = vrot.lane.b32.xlu0 %v643_v57, %s3169_s0 }
 0x7e7   :  { %v538_v58 = vpop.permute.xlu1 %537 }
 0x7e8   :  { %v540_v59 = vmul.f32 %v3021_v43, %v538_v58 }
 0x7ea   :  { %719 = vrot.lane.b32.xlu1 %v540_v59, %s3169_s0 }
 0x858   :  { %v645_v60 = vpop.permute.xlu0 %644 }
 0x859   :  { %2619 = vmatmul.mubr.msk.f32.vlgmr.msra.gmra.mrb[6].mxu0 %vm167_vm3, %v645_v60  ;;  %2641 = vmatmul.mubr.msk.f32.vlgmr.msra.gmra.mrb[4].mxu1 %vm167_vm3, %v645_v60 }
 0x85a   :  { %2853 = vmatpush3.bf16.msra.mxu0 %v3277_v12  ;;  %2629 = vmatprep.mubr.msk.f32.mxu0 %vm3167_vm2, %v3168_v29 }
 0x85b   :  { %2854 = vmatprep.subr.bf16.mxu0 %v3166_v21  ;;  %2865 = vmatpush3.bf16.msra.mxu1 %v3222_v22 }
 0x85c   :  { %2866 = vmatprep.subr.bf16.mxu1 %v3166_v21  ;;  %2651 = vmatprep.mubr.msk.f32.mxu1 %vm3167_vm2, %v3168_v29  ;;  %v720_v61 = vpop.permute.xlu1 %719 }
 0x85e   :  { %2856 = vmatpush3.bf16.msra.mxu0 %v3282_v16 }
 0x85f   :  { %2875 = vmatprep.subr.bf16.mxu0 %v3166_v21  ;;  %2868 = vmatpush3.bf16.msra.mxu1 %v3231_v30 }
 0x860   :  { %2869 = vmatprep.subr.bf16.mxu1 %v3166_v21 }
 0x861   :  { %2630 = vmatmul.mubr.msk.f32.vlgmr.msra.gmra.mrb[6].mxu0 %vm167_vm3, %v720_v61 }
 0x862   :  { %2877 = vmatpush3.bf16.msra.mxu0 %v3224_v26  ;;  %2673 = vmatprep.mubr.msk.f32.mxu0 %vm3167_vm2, %v3168_v29 }
 0x863   :  { %2878 = vmatprep.subr.bf16.mxu0 %v3166_v21 }
 0x866   :  { %2880 = vmatpush3.bf16.msra.mxu0 %v3235_v31 }
 0x867   :  { %2881 = vmatprep.subr.bf16.mxu0 %v3166_v21 }
 0x92c   :  { %v884_v62 = vpop.f32.mrb[4].mxu1 }
 0x92d   :  { %v889_v63 = vrot.slane %v884_v62, 2  ;;  %v2642_v0 = vpop.f32.mrb[5].mxu1 }
 0x92f   :  { %v891_v1 = vadd.f32 %v889_v63, %v3211_v7 }
 0x931   :  { %3026 = vtanh.f32 %v891_v1  ;;  %v2401_v9 = vmul.f32 -1.442695, %v891_v1 }
 0x934   :  { %v789_v2 = vpop.f32.mrb[6].mxu0 }
 0x935   :  { %v2957_v3 = vadd.f32 %v3258_v36, %v789_v2  ;;  %v2631_v4 = vpop.f32.mrb[7].mxu0 }
 0x937   :  { %3028 = vtanh.f32 %v2957_v3  ;;  %v2399_v10 = vmul.f32 -1.442695, %v2957_v3 }
 0x938   :  { %3030 = vpow2.f32 %v2401_v9 }
 0x939   :  { %3032 = vpow2.f32 %v2399_v10 }
 0x93b   :  { %v3027_v6 = vpop.eup %3026 }
 0x93c   :  { %904 = vrot.lane.b32.xlu0 %v3027_v6, %s3165_s1 }
 0x941   :  { %v3029_v8 = vpop.eup %3028 }
 0x942   :  { %803 = vrot.lane.b32.xlu1 %v3029_v8, %s3165_s1  ;;  %v3031_v11 = vpop.eup %3030 }
 0x943   :  { %v895_v13 = vadd.f32 1.0, %v3031_v11  ;;  %v3033_v14 = vpop.eup %3032 }
 0x944   :  { %v797_v7 = vadd.f32 1.0, %v3033_v14 }
 0x945   :  { %3034 = vrcp.f32 %v895_v13 }
 0x946   :  { %3036 = vrcp.f32 %v797_v7 }
 0x94f   :  { %v3035_v15 = vpop.eup %3034 }
 0x950   :  { %v3037_v19 = vpop.eup %3036  ;;  %v902_v25 = vmul.f32 %v3035_v15, %v900_v24 }
 0x951   :  { %v801_v32 = vmul.f32 %v3037_v19, %v3313_v52 }
 0x9ae   :  { %v905_v17 = vpop.permute.xlu0 %904 }
 0x9af   :  { %v907_v18 = vmul.f32 %v3035_v15, %v905_v17 }
 0x9b1   :  { %909 = vrot.lane.b32.xlu0 %v907_v18, %s3165_s1 }
 0x9b4   :  { %v804_v20 = vpop.permute.xlu1 %803 }
 0x9b5   :  { %v806_v23 = vmul.f32 %v3037_v19, %v804_v20 }
 0x9b7   :  { %808 = vrot.lane.b32.xlu1 %v806_v23, %s3165_s1 }
 0xa23   :  { %v910_v27 = vpop.permute.xlu0 %909 }
 0xa24   :  { %v3348_v28 = vadd.f32 %v910_v27, %v902_v25 }
 0xa26   :  { %3038 = vtanh.f32 %v3348_v28  ;;  %v1174_v1 = vrot.slane %v3348_v28, 6 }
 0xa29   :  { %v809_v33 = vpop.permute.xlu1 %808 }
 0xa2a   :  { %v3352_v34 = vadd.f32 %v809_v33, %v801_v32 }
 0xa2c   :  { %3040 = vtanh.f32 %v3352_v34 }
 0xa30   :  { %v3039_v35 = vpop.eup %3038 }
 0xa31   :  { %915 = vrot.lane.b32.xlu0 %v3039_v35, %s3165_s1 }
 0xa36   :  { %v3041_v37 = vpop.eup %3040 }
 0xa37   :  { %814 = vrot.lane.b32.xlu1 %v3041_v37, %s3165_s1 }
 0xaa3   :  { %v916_v38 = vpop.permute.xlu0 %915 }
 0xaa4   :  { %v918_v39 = vmul.f32 %v3035_v15, %v916_v38 }
 0xaa6   :  { %v920_v40 = vrot.slane %v918_v39, 6 }
 0xaa8   :  { %921 = vrot.lane.b32.xlu0 %v920_v40, %s3169_s0 }
 0xaa9   :  { %v815_v41 = vpop.permute.xlu1 %814 }
 0xaaa   :  { %v817_v42 = vmul.f32 %v3037_v19, %v815_v41 }
 0xaac   :  { %996 = vrot.lane.b32.xlu1 %v817_v42, %s3169_s0 }
 0xb1a   :  { %v922_v43 = vpop.permute.xlu0 %921 }
 0xb1b   :  { %2652 = vmatmul.mubr.msk.f32.vlgmr.msra.gmra.mrb[6].mxu1 %vm167_vm3, %v922_v43  ;;  %2674 = vmatmul.mubr.msk.f32.vlgmr.msra.gmra.mrb[8].mxu0 %vm167_vm3, %v922_v43 }
 0xb1c   :  { %2871 = vmatpush3.bf16.msra.mxu1 %v3277_v12  ;;  %2662 = vmatprep.mubr.msk.f32.mxu1 %vm3167_vm2, %v3168_v29 }
 0xb1d   :  { %2872 = vmatprep.subr.bf16.mxu1 %v3166_v21  ;;  %2883 = vmatpush3.bf16.msra.mxu0 %v3222_v22 }
 0xb1e   :  { %2884 = vmatprep.subr.bf16.mxu0 %v3166_v21  ;;  %2684 = vmatprep.mubr.msk.f32.mxu0 %vm3167_vm2, %v3168_v29  ;;  %v997_v44 = vpop.permute.xlu1 %996 }
 0xb20   :  { %2874 = vmatpush3.bf16.msra.mxu1 %v3282_v16 }
 0xb21   :  { %2893 = vmatprep.subr.bf16.mxu1 %v3166_v21  ;;  %2886 = vmatpush3.bf16.msra.mxu0 %v3231_v30 }
 0xb22   :  { %2887 = vmatprep.subr.bf16.mxu0 %v3166_v21 }
 0xb23   :  { %2663 = vmatmul.mubr.msk.f32.vlgmr.msra.gmra.mrb[6].mxu1 %vm167_vm3, %v997_v44 }
 0xb24   :  { %2895 = vmatpush3.bf16.msra.mxu1 %v3224_v26  ;;  %2706 = vmatprep.mubr.msk.f32.mxu1 %vm3167_vm2, %v3168_v29 }
 0xb25   :  { %2896 = vmatprep.subr.bf16.mxu1 %v3166_v21 }
 0xb28   :  { %2898 = vmatpush3.bf16.msra.mxu1 %v3235_v31 }
 0xb29   :  { %2899 = vmatprep.subr.bf16.mxu1 %v3166_v21 }
 0xbee   :  { %v1161_v45 = vpop.f32.mrb[8].mxu0 }
 0xbef   :  { %v1165_v46 = vadd.f32 %v1161_v45, %v3209_v5  ;;  %v2675_v47 = vpop.f32.mrb[9].mxu0 }
 0xbf1   :  { %3042 = vtanh.f32 %v1165_v46  ;;  %v2406_v53 = vmul.f32 -1.442695, %v1165_v46 }
 0xbf6   :  { %v1066_v48 = vpop.f32.mrb[6].mxu1 }
 0xbf7   :  { %v2958_v49 = vadd.f32 %v3258_v36, %v1066_v48  ;;  %v2664_v50 = vpop.f32.mrb[7].mxu1 }
 0xbf9   :  { %3044 = vtanh.f32 %v2958_v49  ;;  %v2404_v54 = vmul.f32 -1.442695, %v2958_v49 }
 0xbfa   :  { %3046 = vpow2.f32 %v2406_v53 }
 0xbfb   :  { %v3043_v51 = vpop.eup %3042  ;;  %3048 = vpow2.f32 %v2404_v54 }
 0xbfc   :  { %1178 = vrot.lane.b32.xlu0 %v3043_v51, %s3165_s1 }
 0xc03   :  { %v3045_v52 = vpop.eup %3044 }
 0xc04   :  { %1080 = vrot.lane.b32.xlu1 %v3045_v52, %s3165_s1  ;;  %v3047_v55 = vpop.eup %3046 }
 0xc05   :  { %v1169_v56 = vadd.f32 1.0, %v3047_v55  ;;  %v3049_v57 = vpop.eup %3048 }
 0xc06   :  { %v1074_v58 = vadd.f32 1.0, %v3049_v57 }
 0xc07   :  { %3050 = vrcp.f32 %v1169_v56 }
 0xc08   :  { %3052 = vrcp.f32 %v1074_v58 }
 0xc11   :  { %v3051_v59 = vpop.eup %3050 }
 0xc12   :  { %v3053_v62 = vpop.eup %3052  ;;  %v1176_v2 = vmul.f32 %v3051_v59, %v1174_v1 }
 0xc13   :  { %v1078_v6 = vmul.f32 %v3053_v62, %v3352_v34 }
 0xc6e   :  { %v1179_v60 = vpop.permute.xlu0 %1178 }
 0xc6f   :  { %v1181_v61 = vmul.f32 %v3051_v59, %v1179_v60 }
 0xc71   :  { %1183 = vrot.lane.b32.xlu0 %v1181_v61, %s3165_s1 }
 0xc76   :  { %v1081_v63 = vpop.permute.xlu1 %1080 }
 0xc77   :  { %v1083_v0 = vmul.f32 %v3053_v62, %v1081_v63 }
 0xc79   :  { %1085 = vrot.lane.b32.xlu1 %v1083_v0, %s3165_s1 }
 0xce3   :  { %v1184_v3 = vpop.permute.xlu0 %1183 }
 0xce4   :  { %v3387_v4 = vadd.f32 %v1184_v3, %v1176_v2 }
 0xce6   :  { %3054 = vtanh.f32 %v3387_v4  ;;  %v1450_v47 = vrot.slane %v3387_v4, 6 }
 0xceb   :  { %v1086_v8 = vpop.permute.xlu1 %1085 }
 0xcec   :  { %v3391_v9 = vadd.f32 %v1086_v8, %v1078_v6 }
 0xcee   :  { %3056 = vtanh.f32 %v3391_v9 }
 0xcf0   :  { %v3055_v10 = vpop.eup %3054 }
 0xcf1   :  { %1189 = vrot.lane.b32.xlu0 %v3055_v10, %s3165_s1 }
 0xcf8   :  { %v3057_v11 = vpop.eup %3056 }
 0xcf9   :  { %1091 = vrot.lane.b32.xlu1 %v3057_v11, %s3165_s1 }
 0xd63   :  { %v1190_v13 = vpop.permute.xlu0 %1189 }
 0xd64   :  { %v1192_v14 = vmul.f32 %v3051_v59, %v1190_v13 }
 0xd66   :  { %1194 = vrot.lane.b32.xlu0 %v1192_v14, %s3169_s0 }
 0xd6b   :  { %v1092_v7 = vpop.permute.xlu1 %1091 }
 0xd6c   :  { %v1094_v15 = vmul.f32 %v3053_v62, %v1092_v7 }
 0xd6e   :  { %1269 = vrot.lane.b32.xlu1 %v1094_v15, %s3169_s0 }
 0xdd8   :  { %v1195_v17 = vpop.permute.xlu0 %1194 }
 0xdd9   :  { %2685 = vmatmul.mubr.msk.f32.vlgmr.msra.gmra.mrb[10].mxu0 %vm167_vm3, %v1195_v17  ;;  %2707 = vmatmul.mubr.msk.f32.vlgmr.msra.gmra.mrb[8].mxu1 %vm167_vm3, %v1195_v17 }
 0xdda   :  { %2889 = vmatpush3.bf16.msra.mxu0 %v3277_v12  ;;  %2695 = vmatprep.mubr.msk.f32.mxu0 %vm3167_vm2, %v3168_v29 }
 0xddb   :  { %2890 = vmatprep.subr.bf16.mxu0 %v3166_v21  ;;  %2901 = vmatpush3.bf16.msra.mxu1 %v3222_v22 }
 0xddc   :  { %2902 = vmatprep.subr.bf16.mxu1 %v3166_v21  ;;  %2717 = vmatprep.mubr.msk.f32.mxu1 %vm3167_vm2, %v3168_v29 }
 0xdde   :  { %2892 = vmatpush3.bf16.msra.mxu0 %v3282_v16 }
 0xddf   :  { %2911 = vmatprep.subr.bf16.mxu0 %v3166_v21  ;;  %2904 = vmatpush3.bf16.msra.mxu1 %v3231_v30 }
 0xde0   :  { %v1270_v18 = vpop.permute.xlu1 %1269  ;;  %2905 = vmatprep.subr.bf16.mxu1 %v3166_v21 }
 0xde1   :  { %2696 = vmatmul.mubr.msk.f32.vlgmr.msra.gmra.mrb[10].mxu0 %vm167_vm3, %v1270_v18 }
 0xde2   :  { %2913 = vmatpush3.bf16.msra.mxu0 %v3224_v26  ;;  %2739 = vmatprep.mubr.msk.f32.mxu0 %vm3167_vm2, %v3168_v29 }
 0xde3   :  { %2914 = vmatprep.subr.bf16.mxu0 %v3166_v21 }
 0xde6   :  { %2916 = vmatpush3.bf16.msra.mxu0 %v3235_v31 }
 0xde7   :  { %2917 = vmatprep.subr.bf16.mxu0 %v3166_v21 }
 0xeac   :  { %v1434_v19 = vpop.f32.mrb[8].mxu1 }
 0xead   :  { %v1439_v20 = vrot.slane %v1434_v19, 6  ;;  %v2708_v23 = vpop.f32.mrb[9].mxu1 }
 0xeaf   :  { %v1441_v24 = vadd.f32 %v1439_v20, %v3209_v5 }
 0xeb1   :  { %3058 = vtanh.f32 %v1441_v24  ;;  %v2411_v34 = vmul.f32 -1.442695, %v1441_v24 }
 0xeb4   :  { %v1339_v25 = vpop.f32.mrb[10].mxu0 }
 0xeb5   :  { %v2959_v27 = vadd.f32 %v3258_v36, %v1339_v25  ;;  %v2697_v28 = vpop.f32.mrb[11].mxu0 }
 0xeb7   :  { %3060 = vtanh.f32 %v2959_v27  ;;  %v2409_v35 = vmul.f32 -1.442695, %v2959_v27 }
 0xeb8   :  { %3062 = vpow2.f32 %v2411_v34 }
 0xeb9   :  { %3064 = vpow2.f32 %v2409_v35 }
 0xebb   :  { %v3059_v32 = vpop.eup %3058 }
 0xebc   :  { %1454 = vrot.lane.b32.xlu0 %v3059_v32, %s3165_s1 }
 0xec1   :  { %v3061_v33 = vpop.eup %3060 }
 0xec2   :  { %1353 = vrot.lane.b32.xlu1 %v3061_v33, %s3165_s1  ;;  %v3063_v37 = vpop.eup %3062 }
 0xec3   :  { %v1445_v38 = vadd.f32 1.0, %v3063_v37  ;;  %v3065_v39 = vpop.eup %3064 }
 0xec4   :  { %v1347_v40 = vadd.f32 1.0, %v3065_v39 }
 0xec5   :  { %3066 = vrcp.f32 %v1445_v38 }
 0xec6   :  { %3068 = vrcp.f32 %v1347_v40 }
 0xecf   :  { %v3067_v41 = vpop.eup %3066 }
 0xed0   :  { %v3069_v44 = vpop.eup %3068  ;;  %v1452_v48 = vmul.f32 %v3067_v41, %v1450_v47 }
 0xed1   :  { %v1351_v51 = vmul.f32 %v3069_v44, %v3391_v9 }
 0xf2e   :  { %v1455_v42 = vpop.permute.xlu0 %1454 }
 0xf2f   :  { %v1457_v43 = vmul.f32 %v3067_v41, %v1455_v42 }
 0xf31   :  { %1459 = vrot.lane.b32.xlu0 %v1457_v43, %s3165_s1 }
 0xf34   :  { %v1354_v45 = vpop.permute.xlu1 %1353 }
 0xf35   :  { %v1356_v46 = vmul.f32 %v3069_v44, %v1354_v45 }
 0xf37   :  { %1358 = vrot.lane.b32.xlu1 %v1356_v46, %s3165_s1 }
 0xfa3   :  { %v1460_v49 = vpop.permute.xlu0 %1459 }
 0xfa4   :  { %v3426_v50 = vadd.f32 %v1460_v49, %v1452_v48 }
 0xfa6   :  { %3070 = vtanh.f32 %v3426_v50  ;;  %v1727_v23 = vrot.slane %v3426_v50, 6 }
 0xfa9   :  { %v1359_v52 = vpop.permute.xlu1 %1358 }
 0xfaa   :  { %v3430_v53 = vadd.f32 %v1359_v52, %v1351_v51 }
 0xfac   :  { %3072 = vtanh.f32 %v3430_v53 }
 0xfb0   :  { %v3071_v54 = vpop.eup %3070 }
 0xfb1   :  { %1465 = vrot.lane.b32.xlu0 %v3071_v54, %s3165_s1 }
 0xfb6   :  { %v3073_v55 = vpop.eup %3072 }
 0xfb7   :  { %1364 = vrot.lane.b32.xlu1 %v3073_v55, %s3165_s1 }
0x1023   :  { %v1466_v56 = vpop.permute.xlu0 %1465 }
0x1024   :  { %v1468_v57 = vmul.f32 %v3067_v41, %v1466_v56 }
0x1026   :  { %v1470_v58 = vrot.slane %v1468_v57, 2 }
0x1028   :  { %1471 = vrot.lane.b32.xlu0 %v1470_v58, %s3169_s0 }
0x1029   :  { %v1365_v59 = vpop.permute.xlu1 %1364 }
0x102a   :  { %v1367_v60 = vmul.f32 %v3069_v44, %v1365_v59 }
0x102c   :  { %1546 = vrot.lane.b32.xlu1 %v1367_v60, %s3169_s0 }
0x109a   :  { %v1472_v61 = vpop.permute.xlu0 %1471 }
0x109b   :  { %2718 = vmatmul.mubr.msk.f32.vlgmr.msra.gmra.mrb[10].mxu1 %vm167_vm3, %v1472_v61  ;;  %2740 = vmatmul.mubr.msk.f32.vlgmr.msra.gmra.mrb[12].mxu0 %vm167_vm3, %v1472_v61 }
0x109c   :  { %2907 = vmatpush3.bf16.msra.mxu1 %v3277_v12  ;;  %2728 = vmatprep.mubr.msk.f32.mxu1 %vm3167_vm2, %v3168_v29 }
0x109d   :  { %2908 = vmatprep.subr.bf16.mxu1 %v3166_v21  ;;  %2919 = vmatpush3.bf16.msra.mxu0 %v3222_v22 }
0x109e   :  { %2920 = vmatprep.subr.bf16.mxu0 %v3166_v21  ;;  %2750 = vmatprep.mubr.msk.f32.mxu0 %vm3167_vm2, %v3168_v29  ;;  %v1547_v62 = vpop.permute.xlu1 %1546 }
0x10a0   :  { %2910 = vmatpush3.bf16.msra.mxu1 %v3282_v16 }
0x10a1   :  { %2929 = vmatprep.subr.bf16.mxu1 %v3166_v21  ;;  %2922 = vmatpush3.bf16.msra.mxu0 %v3231_v30 }
0x10a2   :  { %2923 = vmatprep.subr.bf16.mxu0 %v3166_v21 }
0x10a3   :  { %2729 = vmatmul.mubr.msk.f32.vlgmr.msra.gmra.mrb[10].mxu1 %vm167_vm3, %v1547_v62 }
0x10a4   :  { %2931 = vmatpush3.bf16.msra.mxu1 %v3224_v26  ;;  %2772 = vmatprep.mubr.msk.f32.mxu1 %vm3167_vm2, %v3168_v29 }
0x10a5   :  { %2932 = vmatprep.subr.bf16.mxu1 %v3166_v21 }
0x10a8   :  { %2934 = vmatpush3.bf16.msra.mxu1 %v3235_v31 }
0x10a9   :  { %2935 = vmatprep.subr.bf16.mxu1 %v3166_v21 }
0x116e   :  { %v1711_v63 = vpop.f32.mrb[12].mxu0 }
0x116f   :  { %v1716_v0 = vrot.slane %v1711_v63, 4  ;;  %v2741_v1 = vpop.f32.mrb[13].mxu0 }
0x1171   :  { %v1718_v2 = vadd.f32 %v1716_v0, %v3209_v5 }
0x1173   :  { %3074 = vtanh.f32 %v1718_v2  ;;  %v2416_v31 = vmul.f32 -1.442695, %v1718_v2 }
0x1176   :  { %v1616_v3 = vpop.f32.mrb[10].mxu1 }
0x1177   :  { %v2960_v4 = vadd.f32 %v3258_v36, %v1616_v3  ;;  %v2730_v6 = vpop.f32.mrb[11].mxu1 }
0x1179   :  { %3076 = vtanh.f32 %v2960_v4  ;;  %v2414_v9 = vmul.f32 -1.442695, %v2960_v4 }
0x117a   :  { %3078 = vpow2.f32 %v2416_v31 }
0x117b   :  { %3080 = vpow2.f32 %v2414_v9 }
0x117d   :  { %v3075_v26 = vpop.eup %3074 }
0x117e   :  { %1731 = vrot.lane.b32.xlu0 %v3075_v26, %s3165_s1 }
0x1183   :  { %v3077_v8 = vpop.eup %3076 }
0x1184   :  { %1630 = vrot.lane.b32.xlu1 %v3077_v8, %s3165_s1  ;;  %v3079_v10 = vpop.eup %3078 }
0x1185   :  { %v1722_v11 = vadd.f32 1.0, %v3079_v10  ;;  %v3081_v13 = vpop.eup %3080 }
0x1186   :  { %v1624_v14 = vadd.f32 1.0, %v3081_v13 }
0x1187   :  { %3082 = vrcp.f32 %v1722_v11 }
0x1188   :  { %3084 = vrcp.f32 %v1624_v14 }
0x1191   :  { %v3083_v7 = vpop.eup %3082 }
0x1192   :  { %v3085_v18 = vpop.eup %3084  ;;  %v1729_v24 = vmul.f32 %v3083_v7, %v1727_v23 }
0x1193   :  { %v1628_v28 = vmul.f32 %v3085_v18, %v3430_v53 }
0x11f0   :  { %v1732_v15 = vpop.permute.xlu0 %1731 }
0x11f1   :  { %v1734_v17 = vmul.f32 %v3083_v7, %v1732_v15 }
0x11f3   :  { %1736 = vrot.lane.b32.xlu0 %v1734_v17, %s3165_s1 }
0x11f6   :  { %v1631_v19 = vpop.permute.xlu1 %1630 }
0x11f7   :  { %v1633_v20 = vmul.f32 %v3085_v18, %v1631_v19 }
0x11f9   :  { %1635 = vrot.lane.b32.xlu1 %v1633_v20, %s3165_s1 }
0x1265   :  { %v1737_v25 = vpop.permute.xlu0 %1736 }
0x1266   :  { %v3465_v27 = vadd.f32 %v1737_v25, %v1729_v24 }
0x1268   :  { %3086 = vtanh.f32 %v3465_v27  ;;  %v2004_v62 = vrot.slane %v3465_v27, 6 }
0x126b   :  { %v1636_v32 = vpop.permute.xlu1 %1635 }
0x126c   :  { %v3469_v33 = vadd.f32 %v1636_v32, %v1628_v28  ;;  %v2200_v32 = vld [vmem:[%s3560_s2 + $0x8] sm:$0xff] }
0x126e   :  { %3088 = vtanh.f32 %v3469_v33 }
0x1272   :  { %v3087_v34 = vpop.eup %3086 }
0x1273   :  { %1742 = vrot.lane.b32.xlu0 %v3087_v34, %s3165_s1 }
0x1278   :  { %v3089_v35 = vpop.eup %3088 }
0x1279   :  { %1641 = vrot.lane.b32.xlu1 %v3089_v35, %s3165_s1  ;;  %v2202_v35 = vld [vmem:[%s3560_s2 + $0x18] sm:$0xff] }
0x12e5   :  { %v1743_v37 = vpop.permute.xlu0 %1742 }
0x12e6   :  { %v1745_v38 = vmul.f32 %v3083_v7, %v1743_v37 }
0x12e8   :  { %v1747_v39 = vrot.slane %v1745_v38, 4 }
0x12ea   :  { %1748 = vrot.lane.b32.xlu0 %v1747_v39, %s3169_s0 }
0x12eb   :  { %v1642_v40 = vpop.permute.xlu1 %1641 }
0x12ec   :  { %v1644_v41 = vmul.f32 %v3085_v18, %v1642_v40 }
0x12ee   :  { %1823 = vrot.lane.b32.xlu1 %v1644_v41, %s3169_s0 }
0x135c   :  { %v1749_v42 = vpop.permute.xlu0 %1748 }
0x135d   :  { %2751 = vmatmul.mubr.msk.f32.vlgmr.msra.gmra.mrb[14].mxu0 %vm167_vm3, %v1749_v42  ;;  %2773 = vmatmul.mubr.msk.f32.vlgmr.msra.gmra.mrb[12].mxu1 %vm167_vm3, %v1749_v42  ;;  %v2204_v42 = vld [vmem:[%s3560_s2 + $0x28] sm:$0xff] }
0x135e   :  { %2925 = vmatpush3.bf16.msra.mxu0 %v3277_v12  ;;  %2761 = vmatprep.mubr.msk.f32.mxu0 %vm3167_vm2, %v3168_v29 }
0x135f   :  { %2926 = vmatprep.subr.bf16.mxu0 %v3166_v21  ;;  %2937 = vmatpush3.bf16.msra.mxu1 %v3222_v22 }
0x1360   :  { %2938 = vmatprep.subr.bf16.mxu1 %v3166_v21  ;;  %2783 = vmatprep.mubr.msk.f32.mxu1 %vm3167_vm2, %v3168_v29  ;;  %v1824_v43 = vpop.permute.xlu1 %1823 }
0x1362   :  { %2928 = vmatpush3.bf16.msra.mxu0 %v3282_v16 }
0x1363   :  { %2940 = vmatpush3.bf16.msra.mxu1 %v3231_v30  ;;  %2947 = vmatprep.subr.bf16.mxu0 %v3166_v21 }
0x1364   :  { %2941 = vmatprep.subr.bf16.mxu1 %v3166_v21 }
0x1365   :  { %2762 = vmatmul.mubr.msk.f32.vlgmr.msra.gmra.mrb[14].mxu0 %vm167_vm3, %v1824_v43 }
0x1366   :  { %2805 = vmatprep.mubr.msk.f32.mxu0 %vm3167_vm2, %v3168_v29 }
0x1430   :  { %v1988_v22 = vpop.f32.mrb[12].mxu1 }
0x1431   :  { %v1993_v44 = vrot.slane %v1988_v22, 2  ;;  %v2774_v45 = vpop.f32.mrb[13].mxu1  ;;  %v2425_v22 = vld [vmem:[%s3560_s2 + $0x20] ss:$0 sm:$0xff] }
0x1433   :  { %v1995_v46 = vadd.f32 %v1993_v44, %v3209_v5 }
0x1435   :  { %3090 = vtanh.f32 %v1995_v46  ;;  %v2421_v51 = vmul.f32 -1.442695, %v1995_v46 }
0x1438   :  { %v1893_v47 = vpop.f32.mrb[14].mxu0 }
0x1439   :  { %v2961_v48 = vadd.f32 %v3258_v36, %v1893_v47  ;;  %v2763_v30 = vpop.f32.mrb[15].mxu0 }
0x143b   :  { %3092 = vtanh.f32 %v2961_v48  ;;  %v2419_v52 = vmul.f32 -1.442695, %v2961_v48 }
0x143c   :  { %3094 = vpow2.f32 %v2421_v51 }
0x143d   :  { %3096 = vpow2.f32 %v2419_v52 }
0x143f   :  { %v3091_v49 = vpop.eup %3090 }
0x1440   :  { %2008 = vrot.lane.b32.xlu0 %v3091_v49, %s3165_s1 }
0x1445   :  { %v3093_v50 = vpop.eup %3092 }
0x1446   :  { %1907 = vrot.lane.b32.xlu1 %v3093_v50, %s3165_s1  ;;  %v3095_v53 = vpop.eup %3094 }
0x1447   :  { %v1999_v54 = vadd.f32 1.0, %v3095_v53  ;;  %v3097_v55 = vpop.eup %3096 }
0x1448   :  { %v1901_v5 = vadd.f32 1.0, %v3097_v55 }
0x1449   :  { %3098 = vrcp.f32 %v1999_v54 }
0x144a   :  { %3100 = vrcp.f32 %v1901_v5 }
0x1453   :  { %v3099_v56 = vpop.eup %3098 }
0x1454   :  { %v3101_v59 = vpop.eup %3100  ;;  %v2006_v63 = vmul.f32 %v3099_v56, %v2004_v62 }
0x1455   :  { %v1905_v2 = vmul.f32 %v3101_v59, %v3469_v33  ;;  %v2201_v33 = vld [vmem:[%s3560_s2 + $0x10] sm:$0xff] }
0x1456   :  { %v2951_v37 = vpack.c.bf16 %v2202_v35, %v2201_v33 }
0x14b2   :  { %v2009_v57 = vpop.permute.xlu0 %2008 }
0x14b3   :  { %v2011_v58 = vmul.f32 %v3099_v56, %v2009_v57 }
0x14b5   :  { %2013 = vrot.lane.b32.xlu0 %v2011_v58, %s3165_s1 }
0x14b8   :  { %v1908_v60 = vpop.permute.xlu1 %1907 }
0x14b9   :  { %v1910_v61 = vmul.f32 %v3101_v59, %v1908_v60 }
0x14bb   :  { %1912 = vrot.lane.b32.xlu1 %v1910_v61, %s3165_s1 }
0x1527   :  { %v2014_v0 = vpop.permute.xlu0 %2013 }
0x1528   :  { %v2016_v1 = vadd.f32 %v2014_v0, %v2006_v63 }
0x152a   :  { %3102 = vtanh.f32 %v2016_v1 }
0x152d   :  { %v1913_v3 = vpop.permute.xlu1 %1912 }
0x152e   :  { %v1915_v4 = vadd.f32 %v1913_v3, %v1905_v2 }
0x1530   :  { %3104 = vtanh.f32 %v1915_v4 }
0x1534   :  { %v3103_v6 = vpop.eup %3102 }
0x1535   :  { %2019 = vrot.lane.b32.xlu0 %v3103_v6, %s3165_s1 }
0x153a   :  { %v3105_v26 = vpop.eup %3104 }
0x153b   :  { %1918 = vrot.lane.b32.xlu1 %v3105_v26, %s3165_s1 }
0x15a7   :  { %v2020_v8 = vpop.permute.xlu0 %2019 }
0x15a8   :  { %v2022_v31 = vmul.f32 %v3099_v56, %v2020_v8 }
0x15aa   :  { %v2024_v9 = vrot.slane %v2022_v31, 6 }
0x15ac   :  { %2025 = vrot.lane.b32.xlu0 %v2024_v9, %s3169_s0 }
0x15ad   :  { %v1919_v10 = vpop.permute.xlu1 %1918 }
0x15ae   :  { %v1921_v11 = vmul.f32 %v3101_v59, %v1919_v10 }
0x15b0   :  { %2100 = vrot.lane.b32.xlu1 %v1921_v11, %s3169_s0 }
0x161e   :  { %v2026_v13 = vpop.permute.xlu0 %2025 }
0x161f   :  { %2784 = vmatmul.mubr.msk.f32.vlgmr.msra.gmra.mrb[14].mxu1 %vm167_vm3, %v2026_v13 }
0x1620   :  { %2943 = vmatpush3.bf16.msra.mxu1 %v3277_v12  ;;  %2794 = vmatprep.mubr.msk.f32.mxu1 %vm3167_vm2, %v3168_v29 }
0x1621   :  { %2944 = vmatprep.subr.bf16.mxu1 %v3166_v21 }
0x1622   :  { %v2101_v14 = vpop.permute.xlu1 %2100 }
0x1624   :  { %2946 = vmatpush3.bf16.msra.mxu1 %v3282_v16 }
0x1627   :  { %2795 = vmatmul.mubr.msk.f32.vlgmr.msra.gmra.mrb[14].mxu1 %vm167_vm3, %v2101_v14 }
0x16fa   :  { %v2170_v7 = vpop.f32.mrb[14].mxu1 }
0x16fb   :  { %v2962_v15 = vadd.f32 %v3258_v36, %v2170_v7  ;;  %v2796_v17 = vpop.f32.mrb[15].mxu1  ;;  %v2199_v36 = vld [vmem:[%s3560_s2] sm:$0xff] }
0x16fc   :  { %v2948_v34 = vpack.c.bf16 %v2200_v32, %v2199_v36 }
0x16fd   :  { %3106 = vtanh.f32 %v2962_v15  ;;  %v2424_v19 = vmul.f32 -1.442695, %v2962_v15 }
0x16fe   :  { %2949 = vmatpush3.bf16.msra.mxu0 %v2948_v34 }
0x16ff   :  { %3108 = vpow2.f32 %v2424_v19  ;;  %2950 = vmatprep.subr.bf16.mxu0 %v3166_v21 }
0x1702   :  { %2952 = vmatpush3.bf16.msra.mxu0 %v2951_v37 }
0x1703   :  { %2953 = vmatprep.subr.bf16.mxu0 %v3166_v21  ;;  %v2205_v21 = vld [vmem:[%s3560_s2 + $0x30] sm:$0xff] }
0x1704   :  { %v2954_v43 = vpack.c.bf16 %v2205_v21, %v2204_v42 }
0x1707   :  { %v3107_v18 = vpop.eup %3106 }
0x1708   :  { %2184 = vrot.lane.b32.xlu0 %v3107_v18, %s3165_s1 }
0x1709   :  { %v3109_v12 = vpop.eup %3108 }
0x170a   :  { %v2178_v20 = vadd.f32 1.0, %v3109_v12 }
0x170c   :  { %3110 = vrcp.f32 %v2178_v20 }
0x1716   :  { %v3111_v23 = vpop.eup %3110 }
0x1717   :  { %v2182_v16 = vmul.f32 %v3111_v23, %v1915_v4 }
0x177a   :  { %v2185_v24 = vpop.permute.xlu0 %2184 }
0x177b   :  { %v2187_v25 = vmul.f32 %v3111_v23, %v2185_v24 }
0x177d   :  { %2189 = vrot.lane.b32.xlu1 %v2187_v25, %s3165_s1 }
0x17ef   :  { %v2190_v27 = vpop.permute.xlu1 %2189 }
0x17f0   :  { %v2192_v28 = vadd.f32 %v2190_v27, %v2182_v16 }
0x17f2   :  { %3112 = vtanh.f32 %v2192_v28 }
0x17fc   :  { %v3113_v38 = vpop.eup %3112 }
0x17fd   :  { %2195 = vrot.lane.b32.xlu0 %v3113_v38, %s3165_s1 }
0x186f   :  { %v2196_v39 = vpop.permute.xlu0 %2195 }
0x1870   :  { %v2198_v40 = vmul.f32 %v3111_v23, %v2196_v39 }
0x1872   :  { %2212 = vrot.lane.b32.xlu1 %v2198_v40, %s3169_s0 }
0x18e4   :  { %v2213_v41 = vpop.permute.xlu1 %2212 }
0x18e5   :  { %2806 = vmatmul.mubr.msk.f32.vlgmr.msra.gmra.mrb[16].mxu0 %vm167_vm3, %v2213_v41 }
0x18e6   :  { %2812 = vmatprep.mubr.msk.f32.mxu0 %vm3167_vm2, %v3168_v29  ;;  %2955 = vmatpush3.bf16.msra.mxu0 %v2954_v43  ;;  %v2427_v29 = vld [vmem:[%s3560_s2 + $0x38] ss:$0 sm:$0xff] }
0x19b8   :  { %v2282_v44 = vpop.f32.mrb[16].mxu0 }
0x19b9   :  { %v2283_v45 = vadd.f32 %v2425_v22, %v2282_v44  ;;  %v2807_v46 = vpop.f32.mrb[17].mxu0 }
0x19bb   :  { %v2286_v47 = vmax.f32 %v2283_v45, 0.0 }
0x19bd   :  { %2813 = vmatmul.mubr.msk.f32.vlgmr.msra.gmra.mrb[18].mxu0 %vm2291_vm4, %v2286_v47 }
0x1a90   :  { %v2361_v48 = vpop.f32.mrb[18].mxu0 }
0x1a91   :  { %v2362_v30 = vadd.f32 %v2427_v29, %v2361_v48  ;;  %v2814_v49 = vpop.f32.mrb[19].mxu0 }
0x1a93   :  { %2366 = vst.msk [vmem:[#allocation5] sm:$0x3] %vm2365_vm5, %v2362_v30 }
0x1a94   :  { %3147 = shalt.err (!%p3144_p12)
}
0x1a95   :  { %s3148_s24 = scalar_lea.hbm %s3561_s3, 32 }
0x1a96   :  { %p3149_p13 = scmp.ne.s32.totalorder %s3561_s3, %s3148_s24  ;;  %p3152_p0 = scmp.lt.u32.totalorder %s3148_s24, %s3561_s3 }
0x1a98   :  { %p3154_p1 = pnand %p3152_p0, %p3149_p13 }
0x1a9a   :  { %3157 = shalt.err (!%p3154_p1)
}
0x1a9b   :  { %2376 = dma.vmem_to_hbm [thread:$0]  %s2374_s20, 32, %s3561_s3, [#allocation4]  }
0x1a9c   :  { %3160 = dma.done.wait [#allocation4], 32  }
0x1a9d   :  { %3161 = vsyncadd [#allocation4], 4294967264 }
0x1a9e   :  { %2380 = vsyncpa [#allocation3], 1 }
0x1a9f   :  { %2381 = vsyncpa [#allocation4], 1 }

</bundles_post_ra>
